<compile_context>
chip_gen: v7x
topology: tpu7x:2x2x1
jax: 0.10.0
libtpu: 0.0.40
codegen_flags: <defaults>
</compile_context>

<pallas_src>
import functools
import math

import jax
import jax.numpy as jnp
from jax import lax
from jax.experimental import pallas as pl
from jax.experimental.pallas import tpu as pltpu

LOG2_E = math.log2(math.e)

WIDTH = 64            # dec_blocks[0].in_channels
Z_DIMS = (8, 8)
LAMBDA = 128.0
ENC_C = (32, 48)      # encoder channels at /4 and /8 scales
DEC_C = (48, 32)      # dec_feature channels at /8 and /4 scales

TARGET_TILE = 1024    # rows of the B*H*W axis per block (multiple of 8; sweep 512-2048)
VMEM_LIMIT = 32 * 1024 * 1024


# ---------------------------------------------------------------------------
# Tiling helpers: cdiv grid + explicit padding (never tm=N for huge frames),
# with a second parallel tile axis for v7x megacore.
# ---------------------------------------------------------------------------
def _rup(n, m):
    return ((n + m - 1) // m) * m


def _tiles(n, target=TARGET_TILE):
    tm = min(target, _rup(n, 8))
    n_pad = _rup(n, tm)
    n_tiles = n_pad // tm
    n_out = 2 if (n_tiles % 2 == 0 and n_tiles > 1) else 1
    n_in = n_tiles // n_out
    return tm, n_pad, n_out, n_in


def _pad_rows(x, n_pad):
    n = x.shape[1]
    if n == n_pad:
        return x
    return jnp.pad(x, ((0, 0), (0, n_pad - n), (0, 0)))


def _const_spec(arr):
    nd = arr.ndim
    return pl.BlockSpec(arr.shape, lambda *_, _nd=nd: (0,) * _nd)


# ---------------------------------------------------------------------------
# Fused encoder: enc1 (block-diagonal over the 2x2 sub-blocks) + space_to_depth
# + enc2 in a single pallas_call at /8 row granularity.
# ---------------------------------------------------------------------------
def _encoder_kernel(x_ref, w1_ref, b1_ref, w2_ref, b2_ref, f4_ref, f8_ref):
    x = x_ref[0].astype(jnp.bfloat16)                         # (tm, 192)
    f4 = jnp.maximum(
        jnp.dot(x, w1_ref[...], preferred_element_type=jnp.float32) + b1_ref[...],
        0.0)                                                  # (tm, 128) block-major /4
    f4_16 = f4.astype(jnp.bfloat16)
    f4_ref[...] = f4_16[None]
    f8 = jnp.maximum(
        jnp.dot(f4_16, w2_ref[...], preferred_element_type=jnp.float32) + b2_ref[...],
        0.0)                                                  # (tm, 48)
    f8_ref[...] = f8[None].astype(f8_ref.dtype)


def encoder_fused(fp, x_bm8):
    B, N, cin = x_bm8.shape
    tm, n_pad, n_out, n_in = _tiles(N)
    xp = _pad_rows(x_bm8, n_pad)
    grid = (B, n_out * n_in)

    def row(c):
        return pl.BlockSpec((1, tm, c), lambda b, t: (b, t, 0))

    f4, f8 = pl.pallas_call(
        _encoder_kernel,
        out_shape=(jax.ShapeDtypeStruct((B, n_pad, 4 * ENC_C[0]), jnp.bfloat16),
                   jax.ShapeDtypeStruct((B, n_pad, ENC_C[1]), jnp.bfloat16)),
        grid=grid,
        in_specs=[row(cin), _const_spec(fp["enc_w1"]), _const_spec(fp["enc_b1"]),
                  _const_spec(fp["enc_w2"]), _const_spec(fp["enc_b2"])],
        out_specs=[row(4 * ENC_C[0]), row(ENC_C[1])],
        compiler_params=pltpu.CompilerParams(
            dimension_semantics=("parallel", "parallel"),
            vmem_limit_bytes=VMEM_LIMIT),
    )(xp, fp["enc_w1"], fp["enc_b1"], fp["enc_w2"], fp["enc_b2"])
    if n_pad != N:
        f4, f8 = f4[:, :N], f8[:, :N]
    return f4, f8


# ---------------------------------------------------------------------------
# Fused latent block @ /8 scale (coarsest): merged prior/posterior matmuls,
# constant-bias folding, KL partial accumulation, packed next-frame context,
# and the fea0 / dec1 1x1 convs (block-major output channels).
# ---------------------------------------------------------------------------
def _scale8_kernel(ctx_ref, enc_ref,
                   wctx_ref, wenc_ref, bpq_ref,
                   wzf_ref, cfea_ref, wzd_ref, bzd_ref, wd1_ref, bd1_ref,
                   fea_ref, dec_ref, ctxn_ref, kl_ref,
                   *, tm, n_in, n_rows, need_mask):
    ti = pl.program_id(2)
    f32, bf16 = jnp.float32, jnp.bfloat16
    zd = Z_DIMS[0]

    ctx = ctx_ref[0]                                          # (tm, 16) [prev | cur]
    enc = enc_ref[0]                                          # (tm, 48)

    # merged prior|posterior: lanes [0:2z] = prior, [2z:4z] = posterior.
    pq = (jnp.dot(ctx, wctx_ref[...], preferred_element_type=f32)
          + jnp.dot(enc, wenc_ref[...], preferred_element_type=f32)
          + bpq_ref[...])
    pm, plv = pq[:, 0:zd], pq[:, zd:2 * zd]
    qm, qlv = pq[:, 2 * zd:3 * zd], pq[:, 3 * zd:4 * zd]

    kl = 0.5 * (jnp.exp(qlv - plv) + (qm - pm) ** 2 * jnp.exp(-plv)
                - 1.0 + plv - qlv)
    if need_mask:
        row0 = (pl.program_id(1) * n_in + ti) * tm
        rows = row0 + lax.broadcasted_iota(jnp.int32, (tm, 1), 0)
        kl = jnp.where(rows < n_rows, kl, 0.0)

    @pl.when(ti == 0)
    def _init():
        kl_ref[...] = jnp.zeros_like(kl_ref)

    # per-lane partial: reduce only over the row (sublane) axis.
    kl_ref[...] = kl_ref[...] + jnp.sum(kl, axis=0)[None, None, :]

    z16 = qm.astype(bf16)                                     # deterministic posterior mean
    # packed context for the next frame: [ctx_cur | z_new]
    ctxn_ref[...] = jnp.concatenate([ctx[:, zd:2 * zd], z16], axis=-1)[None]

    # fea0 with the constant coarse-scale bias folded in: relu(z @ (wzup@wfea) + const)
    fea = jnp.maximum(
        jnp.dot(z16, wzf_ref[...], preferred_element_type=f32) + cfea_ref[...], 0.0)
    fea_ref[...] = fea[None].astype(fea_ref.dtype)

    dec0 = jnp.maximum(
        jnp.dot(z16, wzd_ref[...], preferred_element_type=f32) + bzd_ref[...], 0.0)
    dec1 = jnp.maximum(
        jnp.dot(dec0.astype(bf16), wd1_ref[...], preferred_element_type=f32)
        + bd1_ref[...], 0.0)
    dec_ref[...] = dec1[None].astype(dec_ref.dtype)


def latent_scale8(fp, ctx8, f8):
    B, N, _ = ctx8.shape
    tm, n_pad, n_out, n_in = _tiles(N)
    need_mask = n_pad != N
    ctx_p, f8_p = _pad_rows(ctx8, n_pad), _pad_rows(f8, n_pad)
    grid = (B, n_out, n_in)

    def row(c):
        return pl.BlockSpec((1, tm, c), lambda b, o, i: (b, o * n_in + i, 0))

    def acc(w):
        return pl.BlockSpec((1, 1, w), lambda b, o, i: (b * n_out + o, 0, 0))

    kernel = functools.partial(_scale8_kernel, tm=tm, n_in=n_in, n_rows=N,
                               need_mask=need_mask)
    fea, dec, ctx_next, kl = pl.pallas_call(
        kernel,
        out_shape=(
            jax.ShapeDtypeStruct((B, n_pad, 4 * WIDTH), jnp.bfloat16),     # fea0 (block-major)
            jax.ShapeDtypeStruct((B, n_pad, 4 * DEC_C[1]), jnp.bfloat16),  # dec1 (block-major)
            jax.ShapeDtypeStruct((B, n_pad, 2 * Z_DIMS[0]), jnp.bfloat16), # packed ctx_next
            jax.ShapeDtypeStruct((B * n_out, 1, Z_DIMS[0]), jnp.float32),  # KL lane partials
        ),
        grid=grid,
        in_specs=[row(2 * Z_DIMS[0]), row(ENC_C[1]),
                  _const_spec(fp["s8_wctx"]), _const_spec(fp["s8_wenc"]),
                  _const_spec(fp["s8_bpq"]), _const_spec(fp["s8_wzf"]),
                  _const_spec(fp["s8_cfea"]), _const_spec(fp["s8_wzd"]),
                  _const_spec(fp["s8_bzd"]), _const_spec(fp["s8_wd1"]),
                  _const_spec(fp["s8_bd1"])],
        out_specs=[row(4 * WIDTH), row(4 * DEC_C[1]), row(2 * Z_DIMS[0]),
                   acc(Z_DIMS[0])],
        compiler_params=pltpu.CompilerParams(
            dimension_semantics=("parallel", "parallel", "arbitrary"),
            vmem_limit_bytes=VMEM_LIMIT),
    )(ctx_p, f8_p, fp["s8_wctx"], fp["s8_wenc"], fp["s8_bpq"], fp["s8_wzf"],
      fp["s8_cfea"], fp["s8_wzd"], fp["s8_bzd"], fp["s8_wd1"], fp["s8_bd1"])
    if need_mask:
        fea, dec, ctx_next = fea[:, :N], dec[:, :N], ctx_next[:, :N]
    return fea, dec, ctx_next, kl


# ---------------------------------------------------------------------------
# Fused latent block @ /4 scale + final reconstruction conv + MSE reduction.
# All inputs are block-major /4 rows, so no transposes are needed upstream; the
# MSE target is the same HBM buffer the encoder read (free reshape).
# ---------------------------------------------------------------------------
def _scale4_kernel(feat_ref, ctx_ref, enc_ref, dec_ref, x_ref,
                   wf_ref, wctx_ref, wenc_ref, bpq_ref,
                   wzd_ref, bzd_ref, wd3_ref, bd3_ref,
                   ctxn_ref, kl_ref, sse_ref,
                   *, tm, n_in, n_rows, need_mask):
    ti = pl.program_id(2)
    f32, bf16 = jnp.float32, jnp.bfloat16
    zd = Z_DIMS[1]

    feat = feat_ref[0]                                        # (tm, 64)
    ctx = ctx_ref[0]                                          # (tm, 16)
    enc = enc_ref[0]                                          # (tm, 32)

    pq = (jnp.dot(feat, wf_ref[...], preferred_element_type=f32)
          + jnp.dot(ctx, wctx_ref[...], preferred_element_type=f32)
          + jnp.dot(enc, wenc_ref[...], preferred_element_type=f32)
          + bpq_ref[...])
    pm, plv = pq[:, 0:zd], pq[:, zd:2 * zd]
    qm, qlv = pq[:, 2 * zd:3 * zd], pq[:, 3 * zd:4 * zd]
    kl = 0.5 * (jnp.exp(qlv - plv) + (qm - pm) ** 2 * jnp.exp(-plv)
                - 1.0 + plv - qlv)

    z16 = qm.astype(bf16)
    ctxn_ref[...] = jnp.concatenate([ctx[:, zd:2 * zd], z16], axis=-1)[None]

    # NOTE: the zup feature update after the final latent block has no consumer
    # in the forward pass and is elided (output-equivalent).
    dec_new = (dec_ref[0].astype(f32)
               + jnp.dot(z16, wzd_ref[...], preferred_element_type=f32)
               + bzd_ref[...])
    xhat = (jnp.dot(dec_new.astype(bf16), wd3_ref[...], preferred_element_type=f32)
            + bd3_ref[...])                                   # s2d-domain x_hat
    diff = xhat - x_ref[0]                                    # target kept in f32
    sq = diff * diff

    if need_mask:
        row0 = (pl.program_id(1) * n_in + ti) * tm
        rows = row0 + lax.broadcasted_iota(jnp.int32, (tm, 1), 0)
        valid = rows < n_rows
        kl = jnp.where(valid, kl, 0.0)
        sq = jnp.where(valid, sq, 0.0)

    @pl.when(ti == 0)
    def _init():
        kl_ref[...] = jnp.zeros_like(kl_ref)
        sse_ref[...] = jnp.zeros_like(sse_ref)

    kl_ref[...] = kl_ref[...] + jnp.sum(kl, axis=0)[None, None, :]
    sse_ref[...] = sse_ref[...] + jnp.sum(sq, axis=0)[None, None, :]


def latent_scale4(fp, feature4, ctx4, enc4, dec4, x_bm4):
    B, N, _ = feature4.shape
    tm, n_pad, n_out, n_in = _tiles(N)
    need_mask = n_pad != N
    feat_p = _pad_rows(feature4, n_pad)
    ctx_p = _pad_rows(ctx4, n_pad)
    enc_p = _pad_rows(enc4, n_pad)
    dec_p = _pad_rows(dec4, n_pad)
    x_p = _pad_rows(x_bm4, n_pad)
    grid = (B, n_out, n_in)

    def row(c):
        return pl.BlockSpec((1, tm, c), lambda b, o, i: (b, o * n_in + i, 0))

    def acc(w):
        return pl.BlockSpec((1, 1, w), lambda b, o, i: (b * n_out + o, 0, 0))

    kernel = functools.partial(_scale4_kernel, tm=tm, n_in=n_in, n_rows=N,
                               need_mask=need_mask)
    ctx_next, kl, sse = pl.pallas_call(
        kernel,
        out_shape=(
            jax.ShapeDtypeStruct((B, n_pad, 2 * Z_DIMS[1]), jnp.bfloat16),  # packed ctx_next
            jax.ShapeDtypeStruct((B * n_out, 1, Z_DIMS[1]), jnp.float32),   # KL lane partials
            jax.ShapeDtypeStruct((B * n_out, 1, 48), jnp.float32),          # SSE lane partials
        ),
        grid=grid,
        in_specs=[row(WIDTH), row(2 * Z_DIMS[1]), row(ENC_C[0]), row(DEC_C[1]), row(48),
                  _const_spec(fp["s4_wf"]), _const_spec(fp["s4_wctx"]),
                  _const_spec(fp["s4_wenc"]), _const_spec(fp["s4_bpq"]),
                  _const_spec(fp["s4_wzd"]), _const_spec(fp["s4_bzd"]),
                  _const_spec(fp["s4_wd3"]), _const_spec(fp["s4_bd3"])],
        out_specs=[row(2 * Z_DIMS[1]), acc(Z_DIMS[1]), acc(48)],
        compiler_params=pltpu.CompilerParams(
            dimension_semantics=("parallel", "parallel", "arbitrary"),
            vmem_limit_bytes=VMEM_LIMIT),
    )(feat_p, ctx_p, enc_p, dec_p, x_p,
      fp["s4_wf"], fp["s4_wctx"], fp["s4_wenc"], fp["s4_bpq"],
      fp["s4_wzd"], fp["s4_bzd"], fp["s4_wd3"], fp["s4_bd3"])
    if need_mask:
        ctx_next = ctx_next[:, :N]
    return ctx_next, kl, sse


# ---------------------------------------------------------------------------
# Pure-JAX glue: block-major layout and parameter setup / folding
# ---------------------------------------------------------------------------
def block_major_s2d(x_nhwc):
    """(B,H,W,C) -> (B, n8, 64*C) with channel order (ry, rx, sy, sx, c)."""
    B, H, W, C = x_nhwc.shape
    H8, W8 = H // 8, W // 8
    x = x_nhwc.reshape(B, H8, 2, 4, W8, 2, 4, C)
    x = jnp.transpose(x, (0, 1, 4, 2, 5, 3, 6, 7))
    return x.reshape(B, H8 * W8, 64 * C)


def _w(key, cin, cout, fan_in=None):
    fan = cin if fan_in is None else fan_in
    return jax.random.normal(key, (cin, cout), jnp.float32) / math.sqrt(fan)


def _bvec(key, cout):
    return jax.random.normal(key, (cout,), jnp.float32) * 0.1


def init_params(key):
    keys = iter(jax.random.split(key, 48))
    nk = lambda: next(keys)
    z0, z1 = Z_DIMS
    p = {}
    # synthetic FeatureExtractor: 1x1 convs after space-to-depth
    p["enc1_w"], p["enc1_b"] = _w(nk(), 3 * 16, ENC_C[0]), _bvec(nk(), ENC_C[0])
    p["enc2_w"], p["enc2_b"] = _w(nk(), 4 * ENC_C[0], ENC_C[1]), _bvec(nk(), ENC_C[1])
    # latent block 0 (/8)
    fin = WIDTH + 2 * z0
    p["prior0"] = {"wf": _w(nk(), WIDTH, 2 * z0, fin),
                   "wca": _w(nk(), z0, 2 * z0, fin),
                   "wcb": _w(nk(), z0, 2 * z0, fin),
                   "b": _bvec(nk(), 2 * z0)}
    fin = WIDTH + ENC_C[1] + 2 * z0
    p["post0"] = {"wf": _w(nk(), WIDTH, 2 * z0, fin),
                  "we": _w(nk(), ENC_C[1], 2 * z0, fin),
                  "wca": _w(nk(), z0, 2 * z0, fin),
                  "wcb": _w(nk(), z0, 2 * z0, fin),
                  "b": _bvec(nk(), 2 * z0)}
    p["zup0_w"], p["zup0_b"] = _w(nk(), z0, WIDTH), _bvec(nk(), WIDTH)
    p["zdec0_w"], p["zdec0_b"] = _w(nk(), z0, DEC_C[0]), _bvec(nk(), DEC_C[0])
    # fea0 / dec1 output channels declared in block-major (r, c_out) order
    p["fea0_w"], p["fea0_b"] = _w(nk(), WIDTH, 4 * WIDTH), _bvec(nk(), 4 * WIDTH)
    p["dec1_w"], p["dec1_b"] = _w(nk(), DEC_C[0], 4 * DEC_C[1]), _bvec(nk(), 4 * DEC_C[1])
    # latent block 1 (/4)
    fin = WIDTH + 2 * z1
    p["prior1"] = {"wf": _w(nk(), WIDTH, 2 * z1, fin),
                   "wca": _w(nk(), z1, 2 * z1, fin),
                   "wcb": _w(nk(), z1, 2 * z1, fin),
                   "b": _bvec(nk(), 2 * z1)}
    fin = WIDTH + ENC_C[0] + 2 * z1
    p["post1"] = {"wf": _w(nk(), WIDTH, 2 * z1, fin),
                  "we": _w(nk(), ENC_C[0], 2 * z1, fin),
                  "wca": _w(nk(), z1, 2 * z1, fin),
                  "wcb": _w(nk(), z1, 2 * z1, fin),
                  "b": _bvec(nk(), 2 * z1)}
    p["zdec1_w"], p["zdec1_b"] = _w(nk(), z1, DEC_C[1]), _bvec(nk(), DEC_C[1])
    p["dec3_w"], p["dec3_b"] = _w(nk(), DEC_C[1], 3 * 16), _bvec(nk(), 3 * 16)
    # zero-initialized biases, as nn.Parameter(torch.zeros(...)) in the reference
    p["bias"] = jnp.zeros((WIDTH,), jnp.float32)
    p["bias_list"] = [jnp.zeros((z,), jnp.float32) for z in Z_DIMS]
    return p


def fuse_params(p):
    """Fold / merge raw module weights into the fused kernel weights (f32 math,
    bf16 MXU operands).  Done once, outside the frame loop."""
    bf = lambda a: a.astype(jnp.bfloat16)
    z0, z1 = Z_DIMS
    fp = {}

    # encoder: block-diagonal enc1 so enc1 + s2d + enc2 fuse into one kernel.
    w1, b1 = p["enc1_w"], p["enc1_b"]
    w1bd = jnp.zeros((4 * 48, 4 * ENC_C[0]), jnp.float32)
    for r in range(4):
        w1bd = w1bd.at[r * 48:(r + 1) * 48, r * ENC_C[0]:(r + 1) * ENC_C[0]].set(w1)
    fp["enc_w1"] = bf(w1bd)
    fp["enc_b1"] = jnp.tile(b1, 4).reshape(1, -1)
    fp["enc_w2"] = bf(p["enc2_w"])
    fp["enc_b2"] = p["enc2_b"].reshape(1, -1)

    # scale8: merged prior|posterior + constant coarse-scale-bias folding.
    bias = p["bias"]
    p0, q0 = p["prior0"], p["post0"]
    wctx8 = jnp.concatenate(
        [jnp.concatenate([p0["wca"], p0["wcb"]], axis=0),
         jnp.concatenate([q0["wca"], q0["wcb"]], axis=0)], axis=1)          # (16, 32)
    wenc8 = jnp.concatenate(
        [jnp.zeros((ENC_C[1], 2 * z0), jnp.float32), q0["we"]], axis=1)      # (48, 32)
    bpq8 = jnp.concatenate([p0["b"] + bias @ p0["wf"],
                            q0["b"] + bias @ q0["wf"]])                      # (32,)
    fp["s8_wctx"], fp["s8_wenc"], fp["s8_bpq"] = bf(wctx8), bf(wenc8), bpq8.reshape(1, -1)
    wzf = p["zup0_w"] @ p["fea0_w"]                                          # (8, 256)
    cfea = (bias + p["zup0_b"]) @ p["fea0_w"] + p["fea0_b"]                  # (256,)
    fp["s8_wzf"], fp["s8_cfea"] = bf(wzf), cfea.reshape(1, -1)
    fp["s8_wzd"], fp["s8_bzd"] = bf(p["zdec0_w"]), p["zdec0_b"].reshape(1, -1)
    fp["s8_wd1"], fp["s8_bd1"] = bf(p["dec1_w"]), p["dec1_b"].reshape(1, -1)

    # scale4: merged prior|posterior.
    p1, q1 = p["prior1"], p["post1"]
    fp["s4_wf"] = bf(jnp.concatenate([p1["wf"], q1["wf"]], axis=1))          # (64, 32)
    fp["s4_wctx"] = bf(jnp.concatenate(
        [jnp.concatenate([p1["wca"], p1["wcb"]], axis=0),
         jnp.concatenate([q1["wca"], q1["wcb"]], axis=0)], axis=1))          # (16, 32)
    fp["s4_wenc"] = bf(jnp.concatenate(
        [jnp.zeros((ENC_C[0], 2 * z1), jnp.float32), q1["we"]], axis=1))     # (32, 32)
    fp["s4_bpq"] = jnp.concatenate([p1["b"], q1["b"]]).reshape(1, -1)
    fp["s4_wzd"], fp["s4_bzd"] = bf(p["zdec1_w"]), p["zdec1_b"].reshape(1, -1)
    fp["s4_wd3"], fp["s4_bd3"] = bf(p["dec3_w"]), p["dec3_b"].reshape(1, -1)

    fp["bias_list"] = [b for b in p["bias_list"]]
    return fp


def get_temp_bias(fp, B, n8, n4):
    # packed [prev | cur] context, both initialized to the learned bias
    z0 = fp["bias_list"][0].astype(jnp.bfloat16)
    z1 = fp["bias_list"][1].astype(jnp.bfloat16)
    ctx8 = jnp.broadcast_to(jnp.concatenate([z0, z0])[None, None, :], (B, n8, 2 * Z_DIMS[0]))
    ctx4 = jnp.broadcast_to(jnp.concatenate([z1, z1])[None, None, :], (B, n4, 2 * Z_DIMS[1]))
    return ctx8, ctx4


# ---------------------------------------------------------------------------
# Model forward (mirrors HierarchicalVideoCodec.forward / forward_frame)
# ---------------------------------------------------------------------------
def forward_frame(fp, x_nchw, ctx8, ctx4):
    B, _, H, W = x_nchw.shape
    assert H % 8 == 0 and W % 8 == 0
    n8 = (H // 8) * (W // 8)
    n4 = 4 * n8

    x = jnp.transpose(x_nchw, (0, 2, 3, 1)).astype(jnp.float32)       # NHWC
    x_bm8 = block_major_s2d(x)                                        # (B, n8, 192) f32

    # fused encoder (enc1 + s2d + enc2)
    f4_128, f8 = encoder_fused(fp, x_bm8)                             # (B,n8,128), (B,n8,48)

    # latent block 0 (coarsest) + fea0/dec1 upsampling convs (block-major channels)
    fea_out, dec_out, ctx8_next, kl0 = latent_scale8(fp, ctx8, f8)

    # block-major /4 views — pure reshapes, no transposes, no extra HBM traffic.
    feature4 = fea_out.reshape(B, n4, WIDTH)
    dec4 = dec_out.reshape(B, n4, DEC_C[1])
    enc4 = f4_128.reshape(B, n4, ENC_C[0])
    x_bm4 = x_bm8.reshape(B, n4, 48)                                  # same buffer as MSE target

    # latent block 1 + final reconstruction conv + MSE reduction
    ctx4_next, kl1, sse = latent_scale4(fp, feature4, ctx4, enc4, dec4, x_bm4)

    ndims = float(H * W)
    kl_total = jnp.sum(kl0) + jnp.sum(kl1)                            # cross-lane reduce in JAX
    kl_mean = LOG2_E * kl_total / (ndims * B)                         # == kl.mean(0)
    mse_mean = jnp.sum(sse) / float(B * 3 * H * W)                    # == distortion.mean(0)
    loss = kl_mean + LAMBDA * mse_mean                                # == (kl + lmb*D).mean(0)
    psnr = -10.0 * jnp.log10(mse_mean)
    return loss, kl_mean, psnr, (ctx8_next, ctx4_next)


def _forward(fp, frames):
    """frames: (F, B, 3, H, W).  Returns device-scalar stats (no per-frame host syncs)."""
    _, B, _, H, W = frames.shape
    n8 = (H // 8) * (W // 8)
    ctx_init = get_temp_bias(fp, B, n8, 4 * n8)

    def step(carry, frame):
        ctx8, ctx4 = carry
        loss, bpp, psnr, ctx_new = forward_frame(fp, frame, ctx8, ctx4)
        return ctx_new, jnp.stack([loss, bpp, psnr])

    _, per_frame = lax.scan(step, ctx_init, frames)
    m = jnp.mean(per_frame, axis=0)
    return {"loss": m[0], "bpp": m[1], "psnr": m[2]}


forward = jax.jit(_forward)

# TODO(synk): compress/decompress paths (arithmetic entropy coding, struct packing of
# byte strings) have no Pallas equivalent and are not implemented.

if __name__ == "__main__":
    key = jax.random.PRNGKey(0)
    kp, kf = jax.random.split(key)
    raw_params = init_params(kp)
    fused = fuse_params(raw_params)
    # 2 frames, batch=2, 3 channels, 32x32 spatial (stacked NCHW frames)
    frames = jax.random.uniform(kf, (2, 2, 3, 32, 32), jnp.float32)
    stats = forward(fused, frames)
    jax.block_until_ready(stats["loss"])
    print("KERNEL_OK")
</pallas_src>

<mosaic_0001>
module attributes {stable_mosaic.version = 11 : i64} {
  func.func @_encoder_kernel(%arg0: i32, %arg1: i32, %arg2: memref<1x16x192xf32, #tpu.memory_space<vmem>>, %arg3: memref<192x128xbf16, #tpu.memory_space<vmem>>, %arg4: memref<1x128xf32, #tpu.memory_space<vmem>>, %arg5: memref<128x48xbf16, #tpu.memory_space<vmem>>, %arg6: memref<1x48xf32, #tpu.memory_space<vmem>>, %arg7: memref<1x16x128xbf16, #tpu.memory_space<vmem>>, %arg8: memref<1x16x48xbf16, #tpu.memory_space<vmem>>) attributes {dimension_semantics = [#tpu.dimension_semantics<parallel>, #tpu.dimension_semantics<parallel>], iteration_bounds = array<i64: 2, 1>, scalar_prefetch = 0 : i64, scratch_operands = 0 : i64, tpu.core_type = #tpu.core_type<tc>, window_params = [{transform_indices = @transform_0, window_bounds = array<i64: 1, 16, 192>}, {pipeline_mode = #tpu.pipeline_mode<synchronous>, transform_indices = @transform_1, window_bounds = array<i64: 192, 128>}, {pipeline_mode = #tpu.pipeline_mode<synchronous>, transform_indices = @transform_2, window_bounds = array<i64: 1, 128>}, {pipeline_mode = #tpu.pipeline_mode<synchronous>, transform_indices = @transform_3, window_bounds = array<i64: 128, 48>}, {pipeline_mode = #tpu.pipeline_mode<synchronous>, transform_indices = @transform_4, window_bounds = array<i64: 1, 48>}, {transform_indices = @transform_5, window_bounds = array<i64: 1, 16, 128>}, {transform_indices = @transform_6, window_bounds = array<i64: 1, 16, 48>}]} {
    %c0 = arith.constant 0 : index
    %c0_0 = arith.constant 0 : index
    %c0_1 = arith.constant 0 : index
    %0 = vector.load %arg2[%c0, %c0_0, %c0_1] : memref<1x16x192xf32, #tpu.memory_space<vmem>>, vector<1x16x192xf32>
    %1 = vector.shape_cast %0 : vector<1x16x192xf32> to vector<16x192xf32>
    %2 = arith.truncf %1 : vector<16x192xf32> to vector<16x192xbf16>
    %c0_2 = arith.constant 0 : index
    %c0_3 = arith.constant 0 : index
    %3 = vector.load %arg3[%c0_2, %c0_3] : memref<192x128xbf16, #tpu.memory_space<vmem>>, vector<192x128xbf16>
    %cst = arith.constant dense<0.000000e+00> : vector<16x128xf32>
    %4 = tpu.matmul %2, %3, %cst {dimension_numbers = #tpu.dot_dimension_numbers<[1], [0], [0], [1], [0, 0, 1, 1], [], []>} : vector<16x192xbf16>, vector<192x128xbf16>, vector<16x128xf32> -> vector<16x128xf32>
    %c0_4 = arith.constant 0 : index
    %c0_5 = arith.constant 0 : index
    %5 = vector.load %arg4[%c0_4, %c0_5] : memref<1x128xf32, #tpu.memory_space<vmem>>, vector<1x128xf32>
    %6 = vector.broadcast %5 : vector<1x128xf32> to vector<16x128xf32>
    %7 = arith.addf %4, %6 : vector<16x128xf32>
    %cst_6 = arith.constant 0.000000e+00 : f32
    %8 = vector.broadcast %cst_6 : f32 to vector<16x128xf32>
    %9 = arith.maximumf %7, %8 : vector<16x128xf32>
    %10 = arith.truncf %9 : vector<16x128xf32> to vector<16x128xbf16>
    %11 = vector.shape_cast %10 : vector<16x128xbf16> to vector<1x16x128xbf16>
    %c0_7 = arith.constant 0 : index
    %c0_8 = arith.constant 0 : index
    %c0_9 = arith.constant 0 : index
    %12 = vector.load %arg7[%c0_7, %c0_8, %c0_9] : memref<1x16x128xbf16, #tpu.memory_space<vmem>>, vector<1x16x128xbf16>
    tpu.vector_store %arg7[%c0_7, %c0_8, %c0_9], %11 {strides = array<i32>} : memref<1x16x128xbf16, #tpu.memory_space<vmem>>, vector<1x16x128xbf16>,
    %c0_10 = arith.constant 0 : index
    %c0_11 = arith.constant 0 : index
    %13 = vector.load %arg5[%c0_10, %c0_11] : memref<128x48xbf16, #tpu.memory_space<vmem>>, vector<128x48xbf16>
    %cst_12 = arith.constant dense<0.000000e+00> : vector<16x48xf32>
    %14 = tpu.matmul %10, %13, %cst_12 {dimension_numbers = #tpu.dot_dimension_numbers<[1], [0], [0], [1], [0, 0, 1, 1], [], []>} : vector<16x128xbf16>, vector<128x48xbf16>, vector<16x48xf32> -> vector<16x48xf32>
    %c0_13 = arith.constant 0 : index
    %c0_14 = arith.constant 0 : index
    %15 = vector.load %arg6[%c0_13, %c0_14] : memref<1x48xf32, #tpu.memory_space<vmem>>, vector<1x48xf32>
    %16 = vector.broadcast %15 : vector<1x48xf32> to vector<16x48xf32>
    %17 = arith.addf %14, %16 : vector<16x48xf32>
    %cst_15 = arith.constant 0.000000e+00 : f32
    %18 = vector.broadcast %cst_15 : f32 to vector<16x48xf32>
    %19 = arith.maximumf %17, %18 : vector<16x48xf32>
    %20 = vector.shape_cast %19 : vector<16x48xf32> to vector<1x16x48xf32>
    %21 = arith.truncf %20 : vector<1x16x48xf32> to vector<1x16x48xbf16>
    %c0_16 = arith.constant 0 : index
    %c0_17 = arith.constant 0 : index
    %c0_18 = arith.constant 0 : index
    %22 = vector.load %arg8[%c0_16, %c0_17, %c0_18] : memref<1x16x48xbf16, #tpu.memory_space<vmem>>, vector<1x16x48xbf16>
    tpu.vector_store %arg8[%c0_16, %c0_17, %c0_18], %21 {strides = array<i32>} : memref<1x16x48xbf16, #tpu.memory_space<vmem>>, vector<1x16x48xbf16>,
    return
  }
  func.func @transform_0(%arg0: i32, %arg1: i32) -> (i32, i32, i32) {
    %c0_i32 = arith.constant 0 : i32
    %c0_i32_0 = arith.constant 0 : i32
    return %arg0, %arg1, %c0_i32 : i32, i32, i32
  }
  func.func @transform_1(%arg0: i32, %arg1: i32) -> (i32, i32) {
    %c0_i32 = arith.constant 0 : i32
    %c0_i32_0 = arith.constant 0 : i32
    %c0_i32_1 = arith.constant 0 : i32
    return %c0_i32, %c0_i32_0 : i32, i32
  }
  func.func @transform_2(%arg0: i32, %arg1: i32) -> (i32, i32) {
    %c0_i32 = arith.constant 0 : i32
    %c0_i32_0 = arith.constant 0 : i32
    %c0_i32_1 = arith.constant 0 : i32
    return %c0_i32, %c0_i32_0 : i32, i32
  }
  func.func @transform_3(%arg0: i32, %arg1: i32) -> (i32, i32) {
    %c0_i32 = arith.constant 0 : i32
    %c0_i32_0 = arith.constant 0 : i32
    %c0_i32_1 = arith.constant 0 : i32
    return %c0_i32, %c0_i32_0 : i32, i32
  }
  func.func @transform_4(%arg0: i32, %arg1: i32) -> (i32, i32) {
    %c0_i32 = arith.constant 0 : i32
    %c0_i32_0 = arith.constant 0 : i32
    %c0_i32_1 = arith.constant 0 : i32
    return %c0_i32, %c0_i32_0 : i32, i32
  }
  func.func @transform_5(%arg0: i32, %arg1: i32) -> (i32, i32, i32) {
    %c0_i32 = arith.constant 0 : i32
    %c0_i32_0 = arith.constant 0 : i32
    return %arg0, %arg1, %c0_i32 : i32, i32, i32
  }
  func.func @transform_6(%arg0: i32, %arg1: i32) -> (i32, i32, i32) {
    %c0_i32 = arith.constant 0 : i32
    %c0_i32_0 = arith.constant 0 : i32
    return %arg0, %arg1, %c0_i32 : i32, i32, i32
  }
}

module attributes {stable_mosaic.version = 11 : i64} {
  func.func @_scale8_kernel(%arg0: i32, %arg1: i32, %arg2: i32, %arg3: memref<1x16x16xbf16, #tpu.memory_space<vmem>>, %arg4: memref<1x16x48xbf16, #tpu.memory_space<vmem>>, %arg5: memref<16x32xbf16, #tpu.memory_space<vmem>>, %arg6: memref<48x32xbf16, #tpu.memory_space<vmem>>, %arg7: memref<1x32xf32, #tpu.memory_space<vmem>>, %arg8: memref<8x256xbf16, #tpu.memory_space<vmem>>, %arg9: memref<1x256xf32, #tpu.memory_space<vmem>>, %arg10: memref<8x48xbf16, #tpu.memory_space<vmem>>, %arg11: memref<1x48xf32, #tpu.memory_space<vmem>>, %arg12: memref<48x128xbf16, #tpu.memory_space<vmem>>, %arg13: memref<1x128xf32, #tpu.memory_space<vmem>>, %arg14: memref<1x16x256xbf16, #tpu.memory_space<vmem>>, %arg15: memref<1x16x128xbf16, #tpu.memory_space<vmem>>, %arg16: memref<1x16x16xbf16, #tpu.memory_space<vmem>>, %arg17: memref<1x1x8xf32, #tpu.memory_space<vmem>>) attributes {dimension_semantics = [#tpu.dimension_semantics<parallel>, #tpu.dimension_semantics<parallel>, #tpu.dimension_semantics<arbitrary>], iteration_bounds = array<i64: 2, 1, 1>, scalar_prefetch = 0 : i64, scratch_operands = 0 : i64, tpu.core_type = #tpu.core_type<tc>, window_params = [{transform_indices = @transform_0, window_bounds = array<i64: 1, 16, 16>}, {transform_indices = @transform_1, window_bounds = array<i64: 1, 16, 48>}, {pipeline_mode = #tpu.pipeline_mode<synchronous>, transform_indices = @transform_2, window_bounds = array<i64: 16, 32>}, {pipeline_mode = #tpu.pipeline_mode<synchronous>, transform_indices = @transform_3, window_bounds = array<i64: 48, 32>}, {pipeline_mode = #tpu.pipeline_mode<synchronous>, transform_indices = @transform_4, window_bounds = array<i64: 1, 32>}, {pipeline_mode = #tpu.pipeline_mode<synchronous>, transform_indices = @transform_5, window_bounds = array<i64: 8, 256>}, {pipeline_mode = #tpu.pipeline_mode<synchronous>, transform_indices = @transform_6, window_bounds = array<i64: 1, 256>}, {pipeline_mode = #tpu.pipeline_mode<synchronous>, transform_indices = @transform_7, window_bounds = array<i64: 8, 48>}, {pipeline_mode = #tpu.pipeline_mode<synchronous>, transform_indices = @transform_8, window_bounds = array<i64: 1, 48>}, {pipeline_mode = #tpu.pipeline_mode<synchronous>, transform_indices = @transform_9, window_bounds = array<i64: 48, 128>}, {pipeline_mode = #tpu.pipeline_mode<synchronous>, transform_indices = @transform_10, window_bounds = array<i64: 1, 128>}, {transform_indices = @transform_11, window_bounds = array<i64: 1, 16, 256>}, {transform_indices = @transform_12, window_bounds = array<i64: 1, 16, 128>}, {transform_indices = @transform_13, window_bounds = array<i64: 1, 16, 16>}, {transform_indices = @transform_14, window_bounds = array<i64: 1, 1, 8>}]} {
    %c0 = arith.constant 0 : index
    %c0_0 = arith.constant 0 : index
    %c0_1 = arith.constant 0 : index
    %0 = vector.load %arg3[%c0, %c0_0, %c0_1] : memref<1x16x16xbf16, #tpu.memory_space<vmem>>, vector<1x16x16xbf16>
    %1 = vector.shape_cast %0 : vector<1x16x16xbf16> to vector<16x16xbf16>
    %c0_2 = arith.constant 0 : index
    %c0_3 = arith.constant 0 : index
    %c0_4 = arith.constant 0 : index
    %2 = vector.load %arg4[%c0_2, %c0_3, %c0_4] : memref<1x16x48xbf16, #tpu.memory_space<vmem>>, vector<1x16x48xbf16>
    %3 = vector.shape_cast %2 : vector<1x16x48xbf16> to vector<16x48xbf16>
    %c0_5 = arith.constant 0 : index
    %c0_6 = arith.constant 0 : index
    %4 = vector.load %arg5[%c0_5, %c0_6] : memref<16x32xbf16, #tpu.memory_space<vmem>>, vector<16x32xbf16>
    %cst = arith.constant dense<0.000000e+00> : vector<16x32xf32>
    %5 = tpu.matmul %1, %4, %cst {dimension_numbers = #tpu.dot_dimension_numbers<[1], [0], [0], [1], [0, 0, 1, 1], [], []>} : vector<16x16xbf16>, vector<16x32xbf16>, vector<16x32xf32> -> vector<16x32xf32>
    %c0_7 = arith.constant 0 : index
    %c0_8 = arith.constant 0 : index
    %6 = vector.load %arg6[%c0_7, %c0_8] : memref<48x32xbf16, #tpu.memory_space<vmem>>, vector<48x32xbf16>
    %cst_9 = arith.constant dense<0.000000e+00> : vector<16x32xf32>
    %7 = tpu.matmul %3, %6, %cst_9 {dimension_numbers = #tpu.dot_dimension_numbers<[1], [0], [0], [1], [0, 0, 1, 1], [], []>} : vector<16x48xbf16>, vector<48x32xbf16>, vector<16x32xf32> -> vector<16x32xf32>
    %8 = arith.addf %5, %7 : vector<16x32xf32>
    %c0_10 = arith.constant 0 : index
    %c0_11 = arith.constant 0 : index
    %9 = vector.load %arg7[%c0_10, %c0_11] : memref<1x32xf32, #tpu.memory_space<vmem>>, vector<1x32xf32>
    %10 = vector.broadcast %9 : vector<1x32xf32> to vector<16x32xf32>
    %11 = arith.addf %8, %10 : vector<16x32xf32>
    %12 = vector.extract_strided_slice %11 {offsets = [0, 0], sizes = [16, 8], strides = [1, 1]} : vector<16x32xf32> to vector<16x8xf32>
    %13 = vector.extract_strided_slice %11 {offsets = [0, 8], sizes = [16, 8], strides = [1, 1]} : vector<16x32xf32> to vector<16x8xf32>
    %14 = vector.extract_strided_slice %11 {offsets = [0, 16], sizes = [16, 8], strides = [1, 1]} : vector<16x32xf32> to vector<16x8xf32>
    %15 = vector.extract_strided_slice %11 {offsets = [0, 24], sizes = [16, 8], strides = [1, 1]} : vector<16x32xf32> to vector<16x8xf32>
    %16 = arith.subf %15, %13 : vector<16x8xf32>
    %17 = math.exp %16 : vector<16x8xf32>
    %18 = arith.subf %14, %12 : vector<16x8xf32>
    %19 = arith.mulf %18, %18 : vector<16x8xf32>
    %cst_12 = arith.constant 0.000000e+00 : f32
    %20 = vector.broadcast %cst_12 : f32 to vector<16x8xf32>
    %21 = arith.subf %20, %13 : vector<16x8xf32>
    %22 = math.exp %21 : vector<16x8xf32>
    %23 = arith.mulf %19, %22 : vector<16x8xf32>
    %24 = arith.addf %17, %23 : vector<16x8xf32>
    %cst_13 = arith.constant 1.000000e+00 : f32
    %25 = vector.broadcast %cst_13 : f32 to vector<16x8xf32>
    %26 = arith.subf %24, %25 : vector<16x8xf32>
    %27 = arith.addf %26, %13 : vector<16x8xf32>
    %28 = arith.subf %27, %15 : vector<16x8xf32>
    %cst_14 = arith.constant 5.000000e-01 : f32
    %29 = vector.broadcast %cst_14 : f32 to vector<16x8xf32>
    %30 = arith.mulf %29, %28 : vector<16x8xf32>
    %c0_i32 = arith.constant 0 : i32
    %31 = arith.cmpi eq, %arg2, %c0_i32 : i32
    %32 = arith.extui %31 : i1 to i32
    %c0_i32_15 = arith.constant 0 : i32
    %33 = arith.cmpi ne, %32, %c0_i32_15 : i32
    scf.if %33 {
      %cst_50 = arith.constant 0.000000e+00 : f32
      %72 = vector.broadcast %cst_50 : f32 to vector<1x1x8xf32>
      %c0_51 = arith.constant 0 : index
      %c0_52 = arith.constant 0 : index
      %c0_53 = arith.constant 0 : index
      %73 = vector.load %arg17[%c0_51, %c0_52, %c0_53] : memref<1x1x8xf32, #tpu.memory_space<vmem>>, vector<1x1x8xf32>
      tpu.vector_store %arg17[%c0_51, %c0_52, %c0_53], %72 {strides = array<i32>} : memref<1x1x8xf32, #tpu.memory_space<vmem>>, vector<1x1x8xf32>,
    } else {
    }
    %c0_16 = arith.constant 0 : index
    %c0_17 = arith.constant 0 : index
    %c0_18 = arith.constant 0 : index
    %34 = vector.load %arg17[%c0_16, %c0_17, %c0_18] : memref<1x1x8xf32, #tpu.memory_space<vmem>>, vector<1x1x8xf32>
    %cst_19 = arith.constant dense<0.000000e+00> : vector<8xf32>
    %35 = vector.multi_reduction <add>, %30, %cst_19 [0] : vector<16x8xf32> to vector<8xf32>
    %36 = vector.shape_cast %35 : vector<8xf32> to vector<1x1x8xf32>
    %37 = arith.addf %34, %36 : vector<1x1x8xf32>
    %c0_20 = arith.constant 0 : index
    %c0_21 = arith.constant 0 : index
    %c0_22 = arith.constant 0 : index
    %38 = vector.load %arg17[%c0_20, %c0_21, %c0_22] : memref<1x1x8xf32, #tpu.memory_space<vmem>>, vector<1x1x8xf32>
    tpu.vector_store %arg17[%c0_20, %c0_21, %c0_22], %37 {strides = array<i32>} : memref<1x1x8xf32, #tpu.memory_space<vmem>>, vector<1x1x8xf32>,
    %39 = arith.truncf %14 : vector<16x8xf32> to vector<16x8xbf16>
    %40 = vector.extract_strided_slice %1 {offsets = [0, 8], sizes = [16, 8], strides = [1, 1]} : vector<16x16xbf16> to vector<16x8xbf16>
    %41 = tpu.concatenate %40, %39 in 1 : vector<16x8xbf16>, vector<16x8xbf16> -> vector<16x16xbf16>
    %42 = vector.shape_cast %41 : vector<16x16xbf16> to vector<1x16x16xbf16>
    %c0_23 = arith.constant 0 : index
    %c0_24 = arith.constant 0 : index
    %c0_25 = arith.constant 0 : index
    %43 = vector.load %arg16[%c0_23, %c0_24, %c0_25] : memref<1x16x16xbf16, #tpu.memory_space<vmem>>, vector<1x16x16xbf16>
    tpu.vector_store %arg16[%c0_23, %c0_24, %c0_25], %42 {strides = array<i32>} : memref<1x16x16xbf16, #tpu.memory_space<vmem>>, vector<1x16x16xbf16>,
    %c0_26 = arith.constant 0 : index
    %c0_27 = arith.constant 0 : index
    %44 = vector.load %arg8[%c0_26, %c0_27] : memref<8x256xbf16, #tpu.memory_space<vmem>>, vector<8x256xbf16>
    %cst_28 = arith.constant dense<0.000000e+00> : vector<16x256xf32>
    %45 = tpu.matmul %39, %44, %cst_28 {dimension_numbers = #tpu.dot_dimension_numbers<[1], [0], [0], [1], [0, 0, 1, 1], [], []>} : vector<16x8xbf16>, vector<8x256xbf16>, vector<16x256xf32> -> vector<16x256xf32>
    %c0_29 = arith.constant 0 : index
    %c0_30 = arith.constant 0 : index
    %46 = vector.load %arg9[%c0_29, %c0_30] : memref<1x256xf32, #tpu.memory_space<vmem>>, vector<1x256xf32>
    %47 = vector.broadcast %46 : vector<1x256xf32> to vector<16x256xf32>
    %48 = arith.addf %45, %47 : vector<16x256xf32>
    %cst_31 = arith.constant 0.000000e+00 : f32
    %49 = vector.broadcast %cst_31 : f32 to vector<16x256xf32>
    %50 = arith.maximumf %48, %49 : vector<16x256xf32>
    %51 = vector.shape_cast %50 : vector<16x256xf32> to vector<1x16x256xf32>
    %52 = arith.truncf %51 : vector<1x16x256xf32> to vector<1x16x256xbf16>
    %c0_32 = arith.constant 0 : index
    %c0_33 = arith.constant 0 : index
    %c0_34 = arith.constant 0 : index
    %53 = vector.load %arg14[%c0_32, %c0_33, %c0_34] : memref<1x16x256xbf16, #tpu.memory_space<vmem>>, vector<1x16x256xbf16>
    tpu.vector_store %arg14[%c0_32, %c0_33, %c0_34], %52 {strides = array<i32>} : memref<1x16x256xbf16, #tpu.memory_space<vmem>>, vector<1x16x256xbf16>,
    %c0_35 = arith.constant 0 : index
    %c0_36 = arith.constant 0 : index
    %54 = vector.load %arg10[%c0_35, %c0_36] : memref<8x48xbf16, #tpu.memory_space<vmem>>, vector<8x48xbf16>
    %cst_37 = arith.constant dense<0.000000e+00> : vector<16x48xf32>
    %55 = tpu.matmul %39, %54, %cst_37 {dimension_numbers = #tpu.dot_dimension_numbers<[1], [0], [0], [1], [0, 0, 1, 1], [], []>} : vector<16x8xbf16>, vector<8x48xbf16>, vector<16x48xf32> -> vector<16x48xf32>
    %c0_38 = arith.constant 0 : index
    %c0_39 = arith.constant 0 : index
    %56 = vector.load %arg11[%c0_38, %c0_39] : memref<1x48xf32, #tpu.memory_space<vmem>>, vector<1x48xf32>
    %57 = vector.broadcast %56 : vector<1x48xf32> to vector<16x48xf32>
    %58 = arith.addf %55, %57 : vector<16x48xf32>
    %cst_40 = arith.constant 0.000000e+00 : f32
    %59 = vector.broadcast %cst_40 : f32 to vector<16x48xf32>
    %60 = arith.maximumf %58, %59 : vector<16x48xf32>
    %61 = arith.truncf %60 : vector<16x48xf32> to vector<16x48xbf16>
    %c0_41 = arith.constant 0 : index
    %c0_42 = arith.constant 0 : index
    %62 = vector.load %arg12[%c0_41, %c0_42] : memref<48x128xbf16, #tpu.memory_space<vmem>>, vector<48x128xbf16>
    %cst_43 = arith.constant dense<0.000000e+00> : vector<16x128xf32>
    %63 = tpu.matmul %61, %62, %cst_43 {dimension_numbers = #tpu.dot_dimension_numbers<[1], [0], [0], [1], [0, 0, 1, 1], [], []>} : vector<16x48xbf16>, vector<48x128xbf16>, vector<16x128xf32> -> vector<16x128xf32>
    %c0_44 = arith.constant 0 : index
    %c0_45 = arith.constant 0 : index
    %64 = vector.load %arg13[%c0_44, %c0_45] : memref<1x128xf32, #tpu.memory_space<vmem>>, vector<1x128xf32>
    %65 = vector.broadcast %64 : vector<1x128xf32> to vector<16x128xf32>
    %66 = arith.addf %63, %65 : vector<16x128xf32>
    %cst_46 = arith.constant 0.000000e+00 : f32
    %67 = vector.broadcast %cst_46 : f32 to vector<16x128xf32>
    %68 = arith.maximumf %66, %67 : vector<16x128xf32>
    %69 = vector.shape_cast %68 : vector<16x128xf32> to vector<1x16x128xf32>
    %70 = arith.truncf %69 : vector<1x16x128xf32> to vector<1x16x128xbf16>
    %c0_47 = arith.constant 0 : index
    %c0_48 = arith.constant 0 : index
    %c0_49 = arith.constant 0 : index
    %71 = vector.load %arg15[%c0_47, %c0_48, %c0_49] : memref<1x16x128xbf16, #tpu.memory_space<vmem>>, vector<1x16x128xbf16>
    tpu.vector_store %arg15[%c0_47, %c0_48, %c0_49], %70 {strides = array<i32>} : memref<1x16x128xbf16, #tpu.memory_space<vmem>>, vector<1x16x128xbf16>,
    return
  }
  func.func @transform_0(%arg0: i32, %arg1: i32, %arg2: i32) -> (i32, i32, i32) {
    %c1_i32 = arith.constant 1 : i32
    %0 = arith.muli %arg1, %c1_i32 : i32
    %1 = arith.addi %0, %arg2 : i32
    %c0_i32 = arith.constant 0 : i32
    %c0_i32_0 = arith.constant 0 : i32
    return %arg0, %1, %c0_i32 : i32, i32, i32
  }
  func.func @transform_1(%arg0: i32, %arg1: i32, %arg2: i32) -> (i32, i32, i32) {
    %c1_i32 = arith.constant 1 : i32
    %0 = arith.muli %arg1, %c1_i32 : i32
    %1 = arith.addi %0, %arg2 : i32
    %c0_i32 = arith.constant 0 : i32
    %c0_i32_0 = arith.constant 0 : i32
    return %arg0, %1, %c0_i32 : i32, i32, i32
  }
  func.func @transform_2(%arg0: i32, %arg1: i32, %arg2: i32) -> (i32, i32) {
    %c0_i32 = arith.constant 0 : i32
    %c0_i32_0 = arith.constant 0 : i32
    %c0_i32_1 = arith.constant 0 : i32
    return %c0_i32, %c0_i32_0 : i32, i32
  }
  func.func @transform_3(%arg0: i32, %arg1: i32, %arg2: i32) -> (i32, i32) {
    %c0_i32 = arith.constant 0 : i32
    %c0_i32_0 = arith.constant 0 : i32
    %c0_i32_1 = arith.constant 0 : i32
    return %c0_i32, %c0_i32_0 : i32, i32
  }
  func.func @transform_4(%arg0: i32, %arg1: i32, %arg2: i32) -> (i32, i32) {
    %c0_i32 = arith.constant 0 : i32
    %c0_i32_0 = arith.constant 0 : i32
    %c0_i32_1 = arith.constant 0 : i32
    return %c0_i32, %c0_i32_0 : i32, i32
  }
  func.func @transform_5(%arg0: i32, %arg1: i32, %arg2: i32) -> (i32, i32) {
    %c0_i32 = arith.constant 0 : i32
    %c0_i32_0 = arith.constant 0 : i32
    %c0_i32_1 = arith.constant 0 : i32
    return %c0_i32, %c0_i32_0 : i32, i32
  }
  func.func @transform_6(%arg0: i32, %arg1: i32, %arg2: i32) -> (i32, i32) {
    %c0_i32 = arith.constant 0 : i32
    %c0_i32_0 = arith.constant 0 : i32
    %c0_i32_1 = arith.constant 0 : i32
    return %c0_i32, %c0_i32_0 : i32, i32
  }
  func.func @transform_7(%arg0: i32, %arg1: i32, %arg2: i32) -> (i32, i32) {
    %c0_i32 = arith.constant 0 : i32
    %c0_i32_0 = arith.constant 0 : i32
    %c0_i32_1 = arith.constant 0 : i32
    return %c0_i32, %c0_i32_0 : i32, i32
  }
  func.func @transform_8(%arg0: i32, %arg1: i32, %arg2: i32) -> (i32, i32) {
    %c0_i32 = arith.constant 0 : i32
    %c0_i32_0 = arith.constant 0 : i32
    %c0_i32_1 = arith.constant 0 : i32
    return %c0_i32, %c0_i32_0 : i32, i32
  }
  func.func @transform_9(%arg0: i32, %arg1: i32, %arg2: i32) -> (i32, i32) {
    %c0_i32 = arith.constant 0 : i32
    %c0_i32_0 = arith.constant 0 : i32
    %c0_i32_1 = arith.constant 0 : i32
    return %c0_i32, %c0_i32_0 : i32, i32
  }
  func.func @transform_10(%arg0: i32, %arg1: i32, %arg2: i32) -> (i32, i32) {
    %c0_i32 = arith.constant 0 : i32
    %c0_i32_0 = arith.constant 0 : i32
    %c0_i32_1 = arith.constant 0 : i32
    return %c0_i32, %c0_i32_0 : i32, i32
  }
  func.func @transform_11(%arg0: i32, %arg1: i32, %arg2: i32) -> (i32, i32, i32) {
    %c1_i32 = arith.constant 1 : i32
    %0 = arith.muli %arg1, %c1_i32 : i32
    %1 = arith.addi %0, %arg2 : i32
    %c0_i32 = arith.constant 0 : i32
    %c0_i32_0 = arith.constant 0 : i32
    return %arg0, %1, %c0_i32 : i32, i32, i32
  }
  func.func @transform_12(%arg0: i32, %arg1: i32, %arg2: i32) -> (i32, i32, i32) {
    %c1_i32 = arith.constant 1 : i32
    %0 = arith.muli %arg1, %c1_i32 : i32
    %1 = arith.addi %0, %arg2 : i32
    %c0_i32 = arith.constant 0 : i32
    %c0_i32_0 = arith.constant 0 : i32
    return %arg0, %1, %c0_i32 : i32, i32, i32
  }
  func.func @transform_13(%arg0: i32, %arg1: i32, %arg2: i32) -> (i32, i32, i32) {
    %c1_i32 = arith.constant 1 : i32
    %0 = arith.muli %arg1, %c1_i32 : i32
    %1 = arith.addi %0, %arg2 : i32
    %c0_i32 = arith.constant 0 : i32
    %c0_i32_0 = arith.constant 0 : i32
    return %arg0, %1, %c0_i32 : i32, i32, i32
  }
  func.func @transform_14(%arg0: i32, %arg1: i32, %arg2: i32) -> (i32, i32, i32) {
    %c1_i32 = arith.constant 1 : i32
    %0 = arith.muli %arg0, %c1_i32 : i32
    %1 = arith.addi %0, %arg1 : i32
    %c0_i32 = arith.constant 0 : i32
    %c0_i32_0 = arith.constant 0 : i32
    %c0_i32_1 = arith.constant 0 : i32
    return %1, %c0_i32, %c0_i32_0 : i32, i32, i32
  }
}

module attributes {stable_mosaic.version = 11 : i64} {
  func.func @_scale4_kernel(%arg0: i32, %arg1: i32, %arg2: i32, %arg3: memref<1x64x64xbf16, #tpu.memory_space<vmem>>, %arg4: memref<1x64x16xbf16, #tpu.memory_space<vmem>>, %arg5: memref<1x64x32xbf16, #tpu.memory_space<vmem>>, %arg6: memref<1x64x32xbf16, #tpu.memory_space<vmem>>, %arg7: memref<1x64x48xf32, #tpu.memory_space<vmem>>, %arg8: memref<64x32xbf16, #tpu.memory_space<vmem>>, %arg9: memref<16x32xbf16, #tpu.memory_space<vmem>>, %arg10: memref<32x32xbf16, #tpu.memory_space<vmem>>, %arg11: memref<1x32xf32, #tpu.memory_space<vmem>>, %arg12: memref<8x32xbf16, #tpu.memory_space<vmem>>, %arg13: memref<1x32xf32, #tpu.memory_space<vmem>>, %arg14: memref<32x48xbf16, #tpu.memory_space<vmem>>, %arg15: memref<1x48xf32, #tpu.memory_space<vmem>>, %arg16: memref<1x64x16xbf16, #tpu.memory_space<vmem>>, %arg17: memref<1x1x8xf32, #tpu.memory_space<vmem>>, %arg18: memref<1x1x48xf32, #tpu.memory_space<vmem>>) attributes {dimension_semantics = [#tpu.dimension_semantics<parallel>, #tpu.dimension_semantics<parallel>, #tpu.dimension_semantics<arbitrary>], iteration_bounds = array<i64: 2, 1, 1>, scalar_prefetch = 0 : i64, scratch_operands = 0 : i64, tpu.core_type = #tpu.core_type<tc>, window_params = [{transform_indices = @transform_0, window_bounds = array<i64: 1, 64, 64>}, {transform_indices = @transform_1, window_bounds = array<i64: 1, 64, 16>}, {transform_indices = @transform_2, window_bounds = array<i64: 1, 64, 32>}, {transform_indices = @transform_3, window_bounds = array<i64: 1, 64, 32>}, {transform_indices = @transform_4, window_bounds = array<i64: 1, 64, 48>}, {pipeline_mode = #tpu.pipeline_mode<synchronous>, transform_indices = @transform_5, window_bounds = array<i64: 64, 32>}, {pipeline_mode = #tpu.pipeline_mode<synchronous>, transform_indices = @transform_6, window_bounds = array<i64: 16, 32>}, {pipeline_mode = #tpu.pipeline_mode<synchronous>, transform_indices = @transform_7, window_bounds = array<i64: 32, 32>}, {pipeline_mode = #tpu.pipeline_mode<synchronous>, transform_indices = @transform_8, window_bounds = array<i64: 1, 32>}, {pipeline_mode = #tpu.pipeline_mode<synchronous>, transform_indices = @transform_9, window_bounds = array<i64: 8, 32>}, {pipeline_mode = #tpu.pipeline_mode<synchronous>, transform_indices = @transform_10, window_bounds = array<i64: 1, 32>}, {pipeline_mode = #tpu.pipeline_mode<synchronous>, transform_indices = @transform_11, window_bounds = array<i64: 32, 48>}, {pipeline_mode = #tpu.pipeline_mode<synchronous>, transform_indices = @transform_12, window_bounds = array<i64: 1, 48>}, {transform_indices = @transform_13, window_bounds = array<i64: 1, 64, 16>}, {transform_indices = @transform_14, window_bounds = array<i64: 1, 1, 8>}, {transform_indices = @transform_15, window_bounds = array<i64: 1, 1, 48>}]} {
    %c0 = arith.constant 0 : index
    %c0_0 = arith.constant 0 : index
    %c0_1 = arith.constant 0 : index
    %0 = vector.load %arg3[%c0, %c0_0, %c0_1] : memref<1x64x64xbf16, #tpu.memory_space<vmem>>, vector<1x64x64xbf16>
    %1 = vector.shape_cast %0 : vector<1x64x64xbf16> to vector<64x64xbf16>
    %c0_2 = arith.constant 0 : index
    %c0_3 = arith.constant 0 : index
    %c0_4 = arith.constant 0 : index
    %2 = vector.load %arg4[%c0_2, %c0_3, %c0_4] : memref<1x64x16xbf16, #tpu.memory_space<vmem>>, vector<1x64x16xbf16>
    %3 = vector.shape_cast %2 : vector<1x64x16xbf16> to vector<64x16xbf16>
    %c0_5 = arith.constant 0 : index
    %c0_6 = arith.constant 0 : index
    %c0_7 = arith.constant 0 : index
    %4 = vector.load %arg5[%c0_5, %c0_6, %c0_7] : memref<1x64x32xbf16, #tpu.memory_space<vmem>>, vector<1x64x32xbf16>
    %5 = vector.shape_cast %4 : vector<1x64x32xbf16> to vector<64x32xbf16>
    %c0_8 = arith.constant 0 : index
    %c0_9 = arith.constant 0 : index
    %6 = vector.load %arg8[%c0_8, %c0_9] : memref<64x32xbf16, #tpu.memory_space<vmem>>, vector<64x32xbf16>
    %cst = arith.constant dense<0.000000e+00> : vector<64x32xf32>
    %7 = tpu.matmul %1, %6, %cst {dimension_numbers = #tpu.dot_dimension_numbers<[1], [0], [0], [1], [0, 0, 1, 1], [], []>} : vector<64x64xbf16>, vector<64x32xbf16>, vector<64x32xf32> -> vector<64x32xf32>
    %c0_10 = arith.constant 0 : index
    %c0_11 = arith.constant 0 : index
    %8 = vector.load %arg9[%c0_10, %c0_11] : memref<16x32xbf16, #tpu.memory_space<vmem>>, vector<16x32xbf16>
    %cst_12 = arith.constant dense<0.000000e+00> : vector<64x32xf32>
    %9 = tpu.matmul %3, %8, %cst_12 {dimension_numbers = #tpu.dot_dimension_numbers<[1], [0], [0], [1], [0, 0, 1, 1], [], []>} : vector<64x16xbf16>, vector<16x32xbf16>, vector<64x32xf32> -> vector<64x32xf32>
    %10 = arith.addf %7, %9 : vector<64x32xf32>
    %c0_13 = arith.constant 0 : index
    %c0_14 = arith.constant 0 : index
    %11 = vector.load %arg10[%c0_13, %c0_14] : memref<32x32xbf16, #tpu.memory_space<vmem>>, vector<32x32xbf16>
    %cst_15 = arith.constant dense<0.000000e+00> : vector<64x32xf32>
    %12 = tpu.matmul %5, %11, %cst_15 {dimension_numbers = #tpu.dot_dimension_numbers<[1], [0], [0], [1], [0, 0, 1, 1], [], []>} : vector<64x32xbf16>, vector<32x32xbf16>, vector<64x32xf32> -> vector<64x32xf32>
    %13 = arith.addf %10, %12 : vector<64x32xf32>
    %c0_16 = arith.constant 0 : index
    %c0_17 = arith.constant 0 : index
    %14 = vector.load %arg11[%c0_16, %c0_17] : memref<1x32xf32, #tpu.memory_space<vmem>>, vector<1x32xf32>
    %15 = vector.broadcast %14 : vector<1x32xf32> to vector<64x32xf32>
    %16 = arith.addf %13, %15 : vector<64x32xf32>
    %17 = vector.extract_strided_slice %16 {offsets = [0, 0], sizes = [64, 8], strides = [1, 1]} : vector<64x32xf32> to vector<64x8xf32>
    %18 = vector.extract_strided_slice %16 {offsets = [0, 8], sizes = [64, 8], strides = [1, 1]} : vector<64x32xf32> to vector<64x8xf32>
    %19 = vector.extract_strided_slice %16 {offsets = [0, 16], sizes = [64, 8], strides = [1, 1]} : vector<64x32xf32> to vector<64x8xf32>
    %20 = vector.extract_strided_slice %16 {offsets = [0, 24], sizes = [64, 8], strides = [1, 1]} : vector<64x32xf32> to vector<64x8xf32>
    %21 = arith.subf %20, %18 : vector<64x8xf32>
    %22 = math.exp %21 : vector<64x8xf32>
    %23 = arith.subf %19, %17 : vector<64x8xf32>
    %24 = arith.mulf %23, %23 : vector<64x8xf32>
    %cst_18 = arith.constant 0.000000e+00 : f32
    %25 = vector.broadcast %cst_18 : f32 to vector<64x8xf32>
    %26 = arith.subf %25, %18 : vector<64x8xf32>
    %27 = math.exp %26 : vector<64x8xf32>
    %28 = arith.mulf %24, %27 : vector<64x8xf32>
    %29 = arith.addf %22, %28 : vector<64x8xf32>
    %cst_19 = arith.constant 1.000000e+00 : f32
    %30 = vector.broadcast %cst_19 : f32 to vector<64x8xf32>
    %31 = arith.subf %29, %30 : vector<64x8xf32>
    %32 = arith.addf %31, %18 : vector<64x8xf32>
    %33 = arith.subf %32, %20 : vector<64x8xf32>
    %cst_20 = arith.constant 5.000000e-01 : f32
    %34 = vector.broadcast %cst_20 : f32 to vector<64x8xf32>
    %35 = arith.mulf %34, %33 : vector<64x8xf32>
    %36 = arith.truncf %19 : vector<64x8xf32> to vector<64x8xbf16>
    %37 = vector.extract_strided_slice %3 {offsets = [0, 8], sizes = [64, 8], strides = [1, 1]} : vector<64x16xbf16> to vector<64x8xbf16>
    %38 = tpu.concatenate %37, %36 in 1 : vector<64x8xbf16>, vector<64x8xbf16> -> vector<64x16xbf16>
    %39 = vector.shape_cast %38 : vector<64x16xbf16> to vector<1x64x16xbf16>
    %c0_21 = arith.constant 0 : index
    %c0_22 = arith.constant 0 : index
    %c0_23 = arith.constant 0 : index
    %40 = vector.load %arg16[%c0_21, %c0_22, %c0_23] : memref<1x64x16xbf16, #tpu.memory_space<vmem>>, vector<1x64x16xbf16>
    tpu.vector_store %arg16[%c0_21, %c0_22, %c0_23], %39 {strides = array<i32>} : memref<1x64x16xbf16, #tpu.memory_space<vmem>>, vector<1x64x16xbf16>,
    %c0_24 = arith.constant 0 : index
    %c0_25 = arith.constant 0 : index
    %c0_26 = arith.constant 0 : index
    %41 = vector.load %arg6[%c0_24, %c0_25, %c0_26] : memref<1x64x32xbf16, #tpu.memory_space<vmem>>, vector<1x64x32xbf16>
    %42 = vector.shape_cast %41 : vector<1x64x32xbf16> to vector<64x32xbf16>
    %43 = arith.extf %42 : vector<64x32xbf16> to vector<64x32xf32>
    %c0_27 = arith.constant 0 : index
    %c0_28 = arith.constant 0 : index
    %44 = vector.load %arg12[%c0_27, %c0_28] : memref<8x32xbf16, #tpu.memory_space<vmem>>, vector<8x32xbf16>
    %cst_29 = arith.constant dense<0.000000e+00> : vector<64x32xf32>
    %45 = tpu.matmul %36, %44, %cst_29 {dimension_numbers = #tpu.dot_dimension_numbers<[1], [0], [0], [1], [0, 0, 1, 1], [], []>} : vector<64x8xbf16>, vector<8x32xbf16>, vector<64x32xf32> -> vector<64x32xf32>
    %46 = arith.addf %43, %45 : vector<64x32xf32>
    %c0_30 = arith.constant 0 : index
    %c0_31 = arith.constant 0 : index
    %47 = vector.load %arg13[%c0_30, %c0_31] : memref<1x32xf32, #tpu.memory_space<vmem>>, vector<1x32xf32>
    %48 = vector.broadcast %47 : vector<1x32xf32> to vector<64x32xf32>
    %49 = arith.addf %46, %48 : vector<64x32xf32>
    %50 = arith.truncf %49 : vector<64x32xf32> to vector<64x32xbf16>
    %c0_32 = arith.constant 0 : index
    %c0_33 = arith.constant 0 : index
    %51 = vector.load %arg14[%c0_32, %c0_33] : memref<32x48xbf16, #tpu.memory_space<vmem>>, vector<32x48xbf16>
    %cst_34 = arith.constant dense<0.000000e+00> : vector<64x48xf32>
    %52 = tpu.matmul %50, %51, %cst_34 {dimension_numbers = #tpu.dot_dimension_numbers<[1], [0], [0], [1], [0, 0, 1, 1], [], []>} : vector<64x32xbf16>, vector<32x48xbf16>, vector<64x48xf32> -> vector<64x48xf32>
    %c0_35 = arith.constant 0 : index
    %c0_36 = arith.constant 0 : index
    %53 = vector.load %arg15[%c0_35, %c0_36] : memref<1x48xf32, #tpu.memory_space<vmem>>, vector<1x48xf32>
    %54 = vector.broadcast %53 : vector<1x48xf32> to vector<64x48xf32>
    %55 = arith.addf %52, %54 : vector<64x48xf32>
    %c0_37 = arith.constant 0 : index
    %c0_38 = arith.constant 0 : index
    %c0_39 = arith.constant 0 : index
    %56 = vector.load %arg7[%c0_37, %c0_38, %c0_39] : memref<1x64x48xf32, #tpu.memory_space<vmem>>, vector<1x64x48xf32>
    %57 = vector.shape_cast %56 : vector<1x64x48xf32> to vector<64x48xf32>
    %58 = arith.subf %55, %57 : vector<64x48xf32>
    %59 = arith.mulf %58, %58 : vector<64x48xf32>
    %c0_i32 = arith.constant 0 : i32
    %60 = arith.cmpi eq, %arg2, %c0_i32 : i32
    %61 = arith.extui %60 : i1 to i32
    %c0_i32_40 = arith.constant 0 : i32
    %62 = arith.cmpi ne, %61, %c0_i32_40 : i32
    scf.if %62 {
      %cst_55 = arith.constant 0.000000e+00 : f32
      %73 = vector.broadcast %cst_55 : f32 to vector<1x1x8xf32>
      %c0_56 = arith.constant 0 : index
      %c0_57 = arith.constant 0 : index
      %c0_58 = arith.constant 0 : index
      %74 = vector.load %arg17[%c0_56, %c0_57, %c0_58] : memref<1x1x8xf32, #tpu.memory_space<vmem>>, vector<1x1x8xf32>
      tpu.vector_store %arg17[%c0_56, %c0_57, %c0_58], %73 {strides = array<i32>} : memref<1x1x8xf32, #tpu.memory_space<vmem>>, vector<1x1x8xf32>,
      %cst_59 = arith.constant 0.000000e+00 : f32
      %75 = vector.broadcast %cst_59 : f32 to vector<1x1x48xf32>
      %c0_60 = arith.constant 0 : index
      %c0_61 = arith.constant 0 : index
      %c0_62 = arith.constant 0 : index
      %76 = vector.load %arg18[%c0_60, %c0_61, %c0_62] : memref<1x1x48xf32, #tpu.memory_space<vmem>>, vector<1x1x48xf32>
      tpu.vector_store %arg18[%c0_60, %c0_61, %c0_62], %75 {strides = array<i32>} : memref<1x1x48xf32, #tpu.memory_space<vmem>>, vector<1x1x48xf32>,
    } else {
    }
    %c0_41 = arith.constant 0 : index
    %c0_42 = arith.constant 0 : index
    %c0_43 = arith.constant 0 : index
    %63 = vector.load %arg17[%c0_41, %c0_42, %c0_43] : memref<1x1x8xf32, #tpu.memory_space<vmem>>, vector<1x1x8xf32>
    %cst_44 = arith.constant dense<0.000000e+00> : vector<8xf32>
    %64 = vector.multi_reduction <add>, %35, %cst_44 [0] : vector<64x8xf32> to vector<8xf32>
    %65 = vector.shape_cast %64 : vector<8xf32> to vector<1x1x8xf32>
    %66 = arith.addf %63, %65 : vector<1x1x8xf32>
    %c0_45 = arith.constant 0 : index
    %c0_46 = arith.constant 0 : index
    %c0_47 = arith.constant 0 : index
    %67 = vector.load %arg17[%c0_45, %c0_46, %c0_47] : memref<1x1x8xf32, #tpu.memory_space<vmem>>, vector<1x1x8xf32>
    tpu.vector_store %arg17[%c0_45, %c0_46, %c0_47], %66 {strides = array<i32>} : memref<1x1x8xf32, #tpu.memory_space<vmem>>, vector<1x1x8xf32>,
    %c0_48 = arith.constant 0 : index
    %c0_49 = arith.constant 0 : index
    %c0_50 = arith.constant 0 : index
    %68 = vector.load %arg18[%c0_48, %c0_49, %c0_50] : memref<1x1x48xf32, #tpu.memory_space<vmem>>, vector<1x1x48xf32>
    %cst_51 = arith.constant dense<0.000000e+00> : vector<48xf32>
    %69 = vector.multi_reduction <add>, %59, %cst_51 [0] : vector<64x48xf32> to vector<48xf32>
    %70 = vector.shape_cast %69 : vector<48xf32> to vector<1x1x48xf32>
    %71 = arith.addf %68, %70 : vector<1x1x48xf32>
    %c0_52 = arith.constant 0 : index
    %c0_53 = arith.constant 0 : index
    %c0_54 = arith.constant 0 : index
    %72 = vector.load %arg18[%c0_52, %c0_53, %c0_54] : memref<1x1x48xf32, #tpu.memory_space<vmem>>, vector<1x1x48xf32>
    tpu.vector_store %arg18[%c0_52, %c0_53, %c0_54], %71 {strides = array<i32>} : memref<1x1x48xf32, #tpu.memory_space<vmem>>, vector<1x1x48xf32>,
    return
  }
  func.func @transform_0(%arg0: i32, %arg1: i32, %arg2: i32) -> (i32, i32, i32) {
    %c1_i32 = arith.constant 1 : i32
    %0 = arith.muli %arg1, %c1_i32 : i32
    %1 = arith.addi %0, %arg2 : i32
    %c0_i32 = arith.constant 0 : i32
    %c0_i32_0 = arith.constant 0 : i32
    return %arg0, %1, %c0_i32 : i32, i32, i32
  }
  func.func @transform_1(%arg0: i32, %arg1: i32, %arg2: i32) -> (i32, i32, i32) {
    %c1_i32 = arith.constant 1 : i32
    %0 = arith.muli %arg1, %c1_i32 : i32
    %1 = arith.addi %0, %arg2 : i32
    %c0_i32 = arith.constant 0 : i32
    %c0_i32_0 = arith.constant 0 : i32
    return %arg0, %1, %c0_i32 : i32, i32, i32
  }
  func.func @transform_2(%arg0: i32, %arg1: i32, %arg2: i32) -> (i32, i32, i32) {
    %c1_i32 = arith.constant 1 : i32
    %0 = arith.muli %arg1, %c1_i32 : i32
    %1 = arith.addi %0, %arg2 : i32
    %c0_i32 = arith.constant 0 : i32
    %c0_i32_0 = arith.constant 0 : i32
    return %arg0, %1, %c0_i32 : i32, i32, i32
  }
  func.func @transform_3(%arg0: i32, %arg1: i32, %arg2: i32) -> (i32, i32, i32) {
    %c1_i32 = arith.constant 1 : i32
    %0 = arith.muli %arg1, %c1_i32 : i32
    %1 = arith.addi %0, %arg2 : i32
    %c0_i32 = arith.constant 0 : i32
    %c0_i32_0 = arith.constant 0 : i32
    return %arg0, %1, %c0_i32 : i32, i32, i32
  }
  func.func @transform_4(%arg0: i32, %arg1: i32, %arg2: i32) -> (i32, i32, i32) {
    %c1_i32 = arith.constant 1 : i32
    %0 = arith.muli %arg1, %c1_i32 : i32
    %1 = arith.addi %0, %arg2 : i32
    %c0_i32 = arith.constant 0 : i32
    %c0_i32_0 = arith.constant 0 : i32
    return %arg0, %1, %c0_i32 : i32, i32, i32
  }
  func.func @transform_5(%arg0: i32, %arg1: i32, %arg2: i32) -> (i32, i32) {
    %c0_i32 = arith.constant 0 : i32
    %c0_i32_0 = arith.constant 0 : i32
    %c0_i32_1 = arith.constant 0 : i32
    return %c0_i32, %c0_i32_0 : i32, i32
  }
  func.func @transform_6(%arg0: i32, %arg1: i32, %arg2: i32) -> (i32, i32) {
    %c0_i32 = arith.constant 0 : i32
    %c0_i32_0 = arith.constant 0 : i32
    %c0_i32_1 = arith.constant 0 : i32
    return %c0_i32, %c0_i32_0 : i32, i32
  }
  func.func @transform_7(%arg0: i32, %arg1: i32, %arg2: i32) -> (i32, i32) {
    %c0_i32 = arith.constant 0 : i32
    %c0_i32_0 = arith.constant 0 : i32
    %c0_i32_1 = arith.constant 0 : i32
    return %c0_i32, %c0_i32_0 : i32, i32
  }
  func.func @transform_8(%arg0: i32, %arg1: i32, %arg2: i32) -> (i32, i32) {
    %c0_i32 = arith.constant 0 : i32
    %c0_i32_0 = arith.constant 0 : i32
    %c0_i32_1 = arith.constant 0 : i32
    return %c0_i32, %c0_i32_0 : i32, i32
  }
  func.func @transform_9(%arg0: i32, %arg1: i32, %arg2: i32) -> (i32, i32) {
    %c0_i32 = arith.constant 0 : i32
    %c0_i32_0 = arith.constant 0 : i32
    %c0_i32_1 = arith.constant 0 : i32
    return %c0_i32, %c0_i32_0 : i32, i32
  }
  func.func @transform_10(%arg0: i32, %arg1: i32, %arg2: i32) -> (i32, i32) {
    %c0_i32 = arith.constant 0 : i32
    %c0_i32_0 = arith.constant 0 : i32
    %c0_i32_1 = arith.constant 0 : i32
    return %c0_i32, %c0_i32_0 : i32, i32
  }
  func.func @transform_11(%arg0: i32, %arg1: i32, %arg2: i32) -> (i32, i32) {
    %c0_i32 = arith.constant 0 : i32
    %c0_i32_0 = arith.constant 0 : i32
    %c0_i32_1 = arith.constant 0 : i32
    return %c0_i32, %c0_i32_0 : i32, i32
  }
  func.func @transform_12(%arg0: i32, %arg1: i32, %arg2: i32) -> (i32, i32) {
    %c0_i32 = arith.constant 0 : i32
    %c0_i32_0 = arith.constant 0 : i32
    %c0_i32_1 = arith.constant 0 : i32
    return %c0_i32, %c0_i32_0 : i32, i32
  }
  func.func @transform_13(%arg0: i32, %arg1: i32, %arg2: i32) -> (i32, i32, i32) {
    %c1_i32 = arith.constant 1 : i32
    %0 = arith.muli %arg1, %c1_i32 : i32
    %1 = arith.addi %0, %arg2 : i32
    %c0_i32 = arith.constant 0 : i32
    %c0_i32_0 = arith.constant 0 : i32
    return %arg0, %1, %c0_i32 : i32, i32, i32
  }
  func.func @transform_14(%arg0: i32, %arg1: i32, %arg2: i32) -> (i32, i32, i32) {
    %c1_i32 = arith.constant 1 : i32
    %0 = arith.muli %arg0, %c1_i32 : i32
    %1 = arith.addi %0, %arg1 : i32
    %c0_i32 = arith.constant 0 : i32
    %c0_i32_0 = arith.constant 0 : i32
    %c0_i32_1 = arith.constant 0 : i32
    return %1, %c0_i32, %c0_i32_0 : i32, i32, i32
  }
  func.func @transform_15(%arg0: i32, %arg1: i32, %arg2: i32) -> (i32, i32, i32) {
    %c1_i32 = arith.constant 1 : i32
    %0 = arith.muli %arg0, %c1_i32 : i32
    %1 = arith.addi %0, %arg1 : i32
    %c0_i32 = arith.constant 0 : i32
    %c0_i32_0 = arith.constant 0 : i32
    %c0_i32_1 = arith.constant 0 : i32
    return %1, %c0_i32, %c0_i32_0 : i32, i32, i32
  }
}

</mosaic_0001>

<bundles_post_ra>
// kernel: custom-call
= control target key start
LH: loop header
LB: loop body
LE: loop exit
PB: predicated region body
PF: predicated region fallthrough
CT: control target
= control target key end

     0   :  { %s6_s0 = inlined_call_operand.vmem [shape: f32[2,3], index: 0, kind: output, shape index: {}]  }

// kernel: closed_call.40
= control target key start
LH: loop header
LB: loop body
LE: loop exit
PB: predicated region body
PF: predicated region fallthrough
CT: control target
= control target key end

     0   :  { %s940_s21 = smov 0   ;;  %s942_s22 = smov 0   ;;  %s1073_s0 = inlined_call_operand.vmem [shape: f32[2,16,192], index: 0, kind: input, shape index: {}]   ;;  %s1074_s1 = inlined_call_operand.vmem [shape: bf16[192,128], index: 1, kind: input, shape index: {}]   ;;  %s1075_s2 = inlined_call_operand.vmem [shape: f32[1,128], index: 2, kind: input, shape index: {}]   ;;  %s1076_s3 = inlined_call_operand.vmem [shape: bf16[128,48], index: 3, kind: input, shape index: {}]   ;;  %s1077_s4 = inlined_call_operand.vmem [shape: f32[1,48], index: 4, kind: input, shape index: {}]   ;;  %s1078_s5 = inlined_call_operand.vmem [shape: bf16[2,16,128], index: 5, kind: output, shape index: {0}]   ;;  %s1079_s6 = inlined_call_operand.vmem [shape: bf16[2,16,48], index: 6, kind: output, shape index: {1}]  }
   0x1   :  { %s944_s23 = smov 0  }
   0x2 LB: > { %s29_s24 = sadd.s32 1, %s896_s22  ;;  %p754_p0 = scmp.ge.s32.totalorder %s900_s23, 1  ;;  %s900_s23 = sphi %s944_s23, %s17_s23   ;;  %s896_s22 = sphi %s942_s22, %s1081_s22   ;;  %s892_s21 = sphi %s940_s21, %s1080_s21  }
   0x3   : > { %p31_p1 = scmp.ge.s32.totalorder %s29_s24, 2  ;;  %p239_p2 = scmp.lt.s32.totalorder %s900_s23, 3 }
   0x5   : > { %s1083_s24 = smov (%p31_p1, %s29_s24), 0  ;;  %p240_p3 = pnand %p754_p0, %p239_p2 }
   0x6   : > { %v858_v0 = vld [vmem:[%s1074_s1] sm:$0xff] (!%p240_p3)   ;;  %v902_v1 = vmov (!%p240_p3), 0   ;;  %p288_p4 = scmp.lt.s32.totalorder (!%p240_p3), %s892_s21, 1  ;;  %v859_v2 = vld [vmem:[%s1074_s1 + $0x8] sm:$0xff] (!%p240_p3)   ;;  %v903_v3 = vmov (!%p240_p3), 0.0   ;;  %v860_v4 = vld [vmem:[%s1074_s1 + $0x10] sm:$0xff] (!%p240_p3)  }
   0x7   : > { %243 = sbr.rel (%p240_p3) target bundleno = 496 (0x1f0), region = 40  ;;  %432 = vmatprep.subr.bf16.mxu0 (!%p240_p3), %v902_v1  ;;  %811 = vmatprep.subr.bf16.mxu1 (!%p240_p3), %v903_v3  ;;  %v861_v5 = vld [vmem:[%s1074_s1 + $0x18] sm:$0xff] (!%p240_p3)   ;;  %vm428_vm0 = vcmask (!%p240_p3), 523264   ;;  %v862_v8 = vld [vmem:[%s1074_s1 + $0x20] sm:$0xff] (!%p240_p3)   ;;  %v871_v11 = vld [vmem:[%s1076_s3 + $0x8] sm:$0xff] (!%p240_p3)   ;;  %vm904_vm1 = vmmov (!%p240_p3), 0  }
   0x8   : > { %433 = vmatpush1.bf16.msra.mxu0 (!%p240_p3), %v858_v0  ;;  %v870_v10 = vld [vmem:[%s1076_s3] sm:$0xff] (!%p240_p3)   ;;  %v863_v12 = vld [vmem:[%s1074_s1 + $0x28] sm:$0xff] (!%p240_p3)   ;;  %v872_v13 = vld [vmem:[%s1076_s3 + $0x10] sm:$0xff] (!%p240_p3)   ;;  %827 = vmatprep.mubr.msk.bf16.mxu1 (!%p240_p3), %vm904_vm1, %v903_v3  ;;  %vm607_vm2 = vcmask (!%p240_p3), 388096  }
   0x9   : > { %434 = vmatprep.subr.bf16.mxu0 (!%p240_p3), %v902_v1  ;;  %812 = vmatpush3.bf16.msra.mxu1 (!%p240_p3), %v870_v10  ;;  %v864_v14 = vld [vmem:[%s1074_s1 + $0x30] sm:$0xff] (!%p240_p3)   ;;  %v873_v15 = vld [vmem:[%s1076_s3 + $0x18] sm:$0xff] (!%p240_p3)   ;;  %v874_v17 = vld [vmem:[%s1076_s3 + $0x20] sm:$0xff] (!%p240_p3)  }
   0xa   : > { %813 = vmatprep.subr.bf16.mxu1 (!%p240_p3), %v903_v3  ;;  %v865_v16 = vld [vmem:[%s1074_s1 + $0x38] sm:$0xff] (!%p240_p3)   ;;  %v866_v18 = vld [vmem:[%s1074_s1 + $0x40] sm:$0xff] (!%p240_p3)   ;;  %v875_v19 = vld [vmem:[%s1076_s3 + $0x28] sm:$0xff] (!%p240_p3)  }
   0xb   : > { %v867_v20 = vld [vmem:[%s1074_s1 + $0x48] sm:$0xff] (!%p240_p3)   ;;  %v868_v21 = vld [vmem:[%s1074_s1 + $0x50] sm:$0xff] (!%p240_p3)   ;;  %v869_v22 = vld [vmem:[%s1074_s1 + $0x58] sm:$0xff] (!%p240_p3)  }
   0xc   : > { %435 = vmatpush1.bf16.msra.mxu0 (!%p240_p3), %v859_v2  ;;  %v876_v26 = vld [vmem:[%s1076_s3 + $0x30] sm:$0xff] (!%p240_p3)   ;;  %v877_v27 = vld [vmem:[%s1076_s3 + $0x38] sm:$0xff] (!%p240_p3)   ;;  %v761_v28 = vld [vmem:[%s1075_s2] ss:$0 sm:$0xff] (!%p240_p3) }
   0xd   : > { %436 = vmatprep.subr.bf16.mxu0 (!%p240_p3), %v902_v1  ;;  %814 = vmatpush3.bf16.msra.mxu1 (!%p240_p3), %v871_v11  ;;  %v777_v38 = vld [vmem:[%s1077_s4] ss:$0 sm:$0xff] (!%p240_p3) }
   0xe   : > { %s1085_s21 = smov (!%p288_p4, %s892_s21), 1  ;;  %815 = vmatprep.subr.bf16.mxu1 %v903_v3 }
   0xf   : > { %s790_s7 = sshll.u32 %s1085_s21, 5 }
  0x10   : > { %s977_s10 = scalar_lea.vmem %s1073_s0, %s790_s7  ;;  %437 = vmatpush1.bf16.msra.mxu0 %v860_v4  ;;  %s791_s7 = sshll.u32 %s1085_s21, 3 }
  0x11   : > { %438 = vmatprep.subr.bf16.mxu0 %v902_v1  ;;  %v320_v6 = vld [vmem:[%s977_s10 + $0x8] sm:$0xff]  ;;  %v322_v7 = vld [vmem:[%s977_s10 + $0x18] sm:$0xff]  ;;  %816 = vmatpush3.bf16.msra.mxu1 %v872_v13  ;;  %v319_v23 = vld [vmem:[%s977_s10] sm:$0xff]  ;;  %s306_s11 = scalar_lea.vmem %s1078_s5, %s791_s7  ;;  %s316_s15 = scalar_lea.vmem %s1079_s6, %s791_s7 }
  0x12   : > { %v324_v9 = vpack.c.bf16 %v322_v7, %v320_v6  ;;  %817 = vmatprep.subr.bf16.mxu1 %v903_v3  ;;  %v321_v24 = vld [vmem:[%s977_s10 + $0x10] sm:$0xff] }
  0x13   : > { %v323_v25 = vpack.c.bf16 %v321_v24, %v319_v23 }
  0x14   : > { %439 = vmatpush1.bf16.msra.mxu0 %v861_v5  ;;  %774 = vmatprep.mubr.msk.bf16.mxu0 %vm428_vm0, %v324_v9 }
  0x15   : > { %440 = vmatprep.subr.bf16.mxu0 %v902_v1  ;;  %818 = vmatpush3.bf16.msra.mxu1 %v873_v15 }
  0x16   : > { %819 = vmatprep.subr.bf16.mxu1 %v903_v3 }
  0x18   : > { %441 = vmatpush1.bf16.msra.mxu0 %v862_v8 }
  0x19   : > { %442 = vmatprep.subr.bf16.mxu0 %v902_v1  ;;  %820 = vmatpush3.bf16.msra.mxu1 %v874_v17 }
  0x1a   : > { %821 = vmatprep.subr.bf16.mxu1 %v903_v3 }
  0x1c   : > { %443 = vmatpush1.bf16.msra.mxu0 %v863_v12 }
  0x1d   : > { %444 = vmatprep.subr.bf16.mxu0 %v902_v1  ;;  %822 = vmatpush3.bf16.msra.mxu1 %v875_v19 }
  0x1e   : > { %823 = vmatprep.subr.bf16.mxu1 %v903_v3 }
  0x20   : > { %445 = vmatpush1.bf16.msra.mxu0 %v864_v14 }
  0x21   : > { %446 = vmatprep.subr.bf16.mxu0 %v902_v1  ;;  %824 = vmatpush3.bf16.msra.mxu1 %v876_v26 }
  0x22   : > { %825 = vmatprep.subr.bf16.mxu1 %v903_v3 }
  0x24   : > { %447 = vmatpush1.bf16.msra.mxu0 %v865_v16 }
  0x25   : > { %448 = vmatprep.subr.bf16.mxu0 %v902_v1  ;;  %826 = vmatpush3.bf16.msra.mxu1 %v877_v27 }
  0x28   : > { %449 = vmatpush1.bf16.msra.mxu0 %v866_v18 }
  0x29   : > { %450 = vmatprep.subr.bf16.mxu0 %v902_v1 }
  0x2c   : > { %451 = vmatpush1.bf16.msra.mxu0 %v867_v20 }
  0x2d   : > { %452 = vmatprep.subr.bf16.mxu0 %v902_v1 }
  0x30   : > { %453 = vmatpush1.bf16.msra.mxu0 %v868_v21 }
  0x31   : > { %454 = vmatprep.subr.bf16.mxu0 %v902_v1 }
  0x34   : > { %455 = vmatpush1.bf16.msra.mxu0 %v869_v22 }
  0x37   : > { %465 = vmatmul.mubr.bf16.vlgmr.msra.gmra.mrb[0].mxu0 %v323_v25 }
 0x10a   : > { %v466_v29 = vpop.f32.mrb[0].mxu0 }
 0x10b   : > { %v467_v30 = vadd.f32 %v761_v28, %v466_v29  ;;  %v468_v31 = vpop.f32.mrb[1].mxu0 }
 0x10c   : > { %v469_v32 = vpop.f32.mrb[2].mxu0 }
 0x10d   : > { %v470_v33 = vadd.f32 %v761_v28, %v469_v32  ;;  %v471_v34 = vpop.f32.mrb[3].mxu0  ;;  %v473_v35 = vmax.f32 %v467_v30, 0.0 }
 0x10f   : > { %v474_v36 = vmax.f32 %v470_v33, 0.0 }
 0x111   : > { %v475_v37 = vpack.c.bf16 %v474_v36, %v473_v35 }
 0x113   : > { %801 = vst [vmem:[%s306_s11] sm:$0xff] %v475_v37   ;;  %828 = vmatmul.mubr.bf16.vlgmr.msra.gmra.mrb[0].mxu1 %v475_v37 }
 0x1e6   : > { %v590_v39 = vpop.f32.mrb[0].mxu1 }
 0x1e7   : > { %v591_v40 = vadd.f32 %v777_v38, %v590_v39  ;;  %v829_v41 = vpop.f32.mrb[1].mxu1 }
 0x1e8   : > { %v593_v42 = vpop.f32.mrb[2].mxu1 }
 0x1e9   : > { %v597_v43 = vmax.f32 %v591_v40, 0.0  ;;  %v594_v44 = vadd.f32 %v777_v38, %v593_v42  ;;  %v830_v45 = vpop.f32.mrb[3].mxu1 }
 0x1eb   : > { %v795_v46 = vpack.c.bf16 %v597_v43, %v597_v43  ;;  %v598_v47 = vmax.f32 %v594_v44, 0.0 }
 0x1ed   : > { %608 = vst.msk [vmem:[%s316_s15] sm:$0xf] %vm607_vm2, %v795_v46  ;;  %v796_v48 = vpack.c.bf16 %v598_v47, %v598_v47 }
 0x1ef   : > { %609 = vst.msk [vmem:[%s316_s15 + $0x4] sm:$0xf] %vm607_vm2, %v796_v48 }
 0x1f0 PF: > { %s17_s23 = sadd.s32 1, %s900_s23   ;;  %s1080_s21 = smov %s896_s22 }
 0x1f1   : > { %p14_p5 = scmp.ge.s32.totalorder %s17_s23, 4   ;;  %s1081_s22 = smov %s1083_s24 }
 0x1f3   :  { %16 = sbr.rel (!%p14_p5) target bundleno = 2 (0x2), region = 82 }

// kernel: closed_call.41
= control target key start
LH: loop header
LB: loop body
LE: loop exit
PB: predicated region body
PF: predicated region fallthrough
CT: control target
= control target key end

     0   :  { %s1642_s29 = smov 0   ;;  %s1644_s30 = smov 0   ;;  %s1784_s0 = inlined_call_operand.vmem [shape: bf16[2,16,16], index: 0, kind: input, shape index: {}]   ;;  %s1785_s1 = inlined_call_operand.vmem [shape: bf16[2,16,48], index: 1, kind: input, shape index: {}]   ;;  %s1786_s2 = inlined_call_operand.vmem [shape: bf16[16,32], index: 2, kind: input, shape index: {}]   ;;  %s1787_s3 = inlined_call_operand.vmem [shape: bf16[48,32], index: 3, kind: input, shape index: {}]   ;;  %s1788_s4 = inlined_call_operand.vmem [shape: f32[1,32], index: 4, kind: input, shape index: {}]   ;;  %s1789_s5 = inlined_call_operand.vmem [shape: bf16[8,256], index: 5, kind: input, shape index: {}]   ;;  %s1790_s6 = inlined_call_operand.vmem [shape: f32[1,256], index: 6, kind: input, shape index: {}]   ;;  %s1791_s7 = inlined_call_operand.vmem [shape: bf16[8,48], index: 7, kind: input, shape index: {}]   ;;  %s1792_s8 = inlined_call_operand.vmem [shape: f32[1,48], index: 8, kind: input, shape index: {}]   ;;  %s1793_s9 = inlined_call_operand.vmem [shape: bf16[48,128], index: 9, kind: input, shape index: {}]   ;;  %s1794_s10 = inlined_call_operand.vmem [shape: f32[1,128], index: 10, kind: input, shape index: {}]   ;;  %s1795_s11 = inlined_call_operand.vmem [shape: bf16[2,16,256], index: 11, kind: output, shape index: {0}]   ;;  %s1796_s12 = inlined_call_operand.vmem [shape: bf16[2,16,128], index: 12, kind: output, shape index: {1}]   ;;  %s1797_s13 = inlined_call_operand.vmem [shape: bf16[2,16,16], index: 13, kind: output, shape index: {2}]   ;;  %s1798_s14 = inlined_call_operand.vmem [shape: f32[2,1,8], index: 14, kind: output, shape index: {3}]  }
   0x1   :  { %s1646_s15 = smov 0  }
   0x2 LB: > { %s44_s16 = sadd.s32 1, %s1552_s30  ;;  %p1383_p0 = scmp.ge.s32.totalorder %s1556_s15, 1  ;;  %s1556_s15 = sphi %s1646_s15, %s25_s15   ;;  %s1552_s30 = sphi %s1644_s30, %s1800_s30   ;;  %s1548_s29 = sphi %s1642_s29, %s1799_s29  }
   0x3   : > { %p46_p1 = scmp.ge.s32.totalorder %s44_s16, 2  ;;  %p484_p2 = scmp.lt.s32.totalorder %s1556_s15, 3 }
   0x5   : > { %s1802_s16 = smov (%p46_p1, %s44_s16), 0  ;;  %p485_p3 = pnand %p1383_p0, %p484_p2 }
   0x6   : > { %v1515_v0 = vld [vmem:[%s1787_s3] sm:$0xff] (!%p485_p3)   ;;  %v1558_v1 = vmov (!%p485_p3), 0.0   ;;  %v1516_v2 = vld [vmem:[%s1787_s3 + $0x8] sm:$0xff] (!%p485_p3)   ;;  %vm1559_vm0 = vmmov (!%p485_p3), 0   ;;  %p577_p4 = scmp.lt.s32.totalorder (!%p485_p3), %s1548_s29, 1  ;;  %v1518_v4 = vld [vmem:[%s1787_s3 + $0x10] sm:$0xff] (!%p485_p3)  }
   0x7   : > { %488 = sbr.rel (%p485_p3) target bundleno = 795 (0x31b), region = 64  ;;  %1450 = vmatprep.subr.bf16.mxu0 (!%p485_p3), %v1558_v1  ;;  %1460 = vmatprep.subr.bf16.mxu1 (!%p485_p3), %v1558_v1  ;;  %v1517_v3 = vld [vmem:[%s1786_s2] sm:$0xff] (!%p485_p3)   ;;  %vm733_vm1 = vcmask (!%p485_p3), 130048   ;;  %vm677_vm2 = vcmask (!%p485_p3), 392192   ;;  %vm918_vm3 = vcmask (!%p485_p3), 1043456   ;;  %v1560_v13 = vmov (!%p485_p3), 0  }
   0x8   : > { %1451 = vmatpush3.bf16.msra.mxu0 (!%p485_p3), %v1515_v0  ;;  %1462 = vmatprep.mubr.msk.bf16.mxu1 (!%p485_p3), %vm1559_vm0, %v1558_v1  ;;  %v986_v7 = vld [vmem:[%s1791_s7] sm:$0xf] (!%p485_p3)  ;;  %s1561_s27 = smov (!%p485_p3), 16   ;;  %s1563_s17 = smov (!%p485_p3), 8   ;;  %vm881_vm4 = vcmask (!%p485_p3), 64512   ;;  %v1524_v46 = vld [vmem:[%s1793_s9 + $0x8] sm:$0xff] (!%p485_p3)  }
   0x9   : > { %1452 = vmatprep.subr.bf16.mxu0 (!%p485_p3), %v1558_v1  ;;  %1456 = vmatprep.mubr.msk.bf16.mxu0 (!%p485_p3), %vm1559_vm0, %v1558_v1  ;;  %v895_v8 = vld [vmem:[%s1789_s5] sm:$0xff] (!%p485_p3)  ;;  %v995_v9 = vsel (!%p485_p3), %vm918_vm3, %v986_v7, 0  ;;  %s1564_s18 = smov (!%p485_p3), 120   ;;  %v1525_v47 = vld [vmem:[%s1793_s9 + $0x10] sm:$0xff] (!%p485_p3)   ;;  %vm841_vm5 = vcmask (!%p485_p3), 57344   ;;  %vm892_vm6 = vcmask (!%p485_p3), 125952  }
   0xa   : > { %1461 = vmatpush3.bf16.msra.mxu1 (!%p485_p3), %v1517_v3  ;;  %v1408_v10 = vcombine.high (!%p485_p3), %v895_v8, %v895_v8  ;;  %v1407_v11 = vcombine.low (!%p485_p3), %v895_v8, %v895_v8  ;;  %v1402_v18 = vld [vmem:[%s1788_s4] ss:$0 sm:$0xff] (!%p485_p3)  ;;  %vm844_vm7 = vcmask (!%p485_p3), 261312   ;;  %s1566_s20 = smov (!%p485_p3), 104  }
   0xb   : > { %v1523_v45 = vld [vmem:[%s1793_s9] sm:$0xff] (!%p485_p3)  }
   0xc   : > { %1453 = vmatpush3.bf16.msra.mxu0 (!%p485_p3), %v1516_v2  ;;  %1409 = vmatprep.subr.msk.bf16.mxu1 (!%p485_p3), %vm918_vm3, %v1408_v10  ;;  %v920_v12 = vsel (!%p485_p3), %vm918_vm3, %v1407_v11, 0  ;;  %v858_v11 = vlaneseq (!%p485_p3) }
   0xd   : > { %1454 = vmatprep.subr.bf16.mxu0 (!%p485_p3), %v1558_v1 }
   0xe   : > { %s1804_s29 = smov (!%p577_p4, %s1548_s29), 1 }
   0xf   : > { %s1682_s25 = sshll.u32 %s1804_s29, 3  ;;  %s1426_s26 = sshll.u32 %s1804_s29, 4 }
  0x10   : > { %s584_s28 = scalar_lea.vmem %s1784_s0, %s1682_s25  ;;  %s596_s19 = scalar_lea.vmem %s1785_s1, %s1682_s25  ;;  %1455 = vmatpush3.bf16.msra.mxu0 %v1518_v4 }
  0x11   : > { %v1693_v5 = vld [vmem:[%s584_s28] sm:$0xff]   ;;  %1466 = vmatprep.subr.bf16.mxu0 %v1558_v1  ;;  %s1562_s28 = smov 112   ;;  %s621_s22 = scalar_lea.vmem %s1796_s12, %s1682_s25 }
  0x12   : > { %v1520_v6 = vld [vmem:[%s596_s19] sm:$0xff]   ;;  %1463 = vmatmul.mubr.msk.bf16.vlgmr.msra.gmra.mrb[0].mxu1 %vm733_vm1, %v1693_v5  ;;  %s633_s19 = scalar_lea.vmem %s1797_s13, %s1682_s25 }
  0x13   : > { %1457 = vmatmul.mubr.msk.bf16.vlgmr.msra.gmra.mrb[0].mxu0 %vm677_vm2, %v1520_v6  ;;  %926 = vmatpush1.bf16.msra.mxu1 %v920_v12 }
  0x14   : > { %1468 = vmatprep.mubr.msk.bf16.mxu0 %vm1559_vm0, %v1558_v1  ;;  %1467 = vmatpush3.bf16.msra.mxu0 %v995_v9  ;;  %v1565_v9 = vmov 1966171168  }
  0x15   : > { %1472 = vmatprep.subr.bf16.mxu1 %v1558_v1  ;;  %957 = vmatprep.mubr.bf16.mxu1 %v1560_v13  ;;  %v856_v10 = vunpack.c.l.s4 %v1565_v9 }
  0xe5   : > { %v771_v14 = vpop.f32.mrb[0].mxu1 }
  0xe6   : > { %v1464_v15 = vpop.f32.mrb[1].mxu1  ;;  %v715_v17 = vpop.f32.mrb[0].mxu0 }
  0xe7   : > { %v774_v16 = vpop.f32.mrb[2].mxu1  ;;  %v772_v20 = vadd.f32 %v771_v14, %v715_v17  ;;  %v1458_v21 = vpop.f32.mrb[1].mxu0  ;;  %v857_v14 = vunpack.c.0.s8 %v856_v10  ;;  %v859_v15 = vshrl.u32 %v858_v11, 7 }
  0xe8   : > { %v1465_v19 = vpop.f32.mrb[3].mxu1  ;;  %v718_v22 = vpop.f32.mrb[2].mxu0 }
  0xe9   : > { %v1710_v23 = vadd.f32 %v1402_v18, %v772_v20  ;;  %v775_v24 = vadd.f32 %v774_v16, %v718_v22  ;;  %v1459_v25 = vpop.f32.mrb[3].mxu0  ;;  %v900_v22 = vsub.s32 0, %v859_v15 }
  0xeb   : > { %v803_v26 = vsub.f32 0.0, %v1710_v23  ;;  %v1713_v27 = vadd.f32 %v1402_v18, %v775_v24  ;;  %v860_v18 = vsub.s32 %v857_v14, %v859_v15  ;;  %v904_v24 = vsub.s32 1, %v859_v15 }
  0xed   : > { %v805_v28 = vmul.f32 1.442695, %v803_v26  ;;  %v804_v29 = vsub.f32 0.0, %v1713_v27  ;;  %791 = vrot.lane.b32.xlu1 %v1713_v27, %s1561_s27  ;;  %v875_v30 = vpack.c.bf16 %v1713_v27, %v1710_v23  ;;  %v1413_v26 = vld [vmem:[%s1792_s8] ss:$0 sm:$0xff] }
  0xef   : > { %1526 = vpow2.f32 %v805_v28  ;;  %v807_v31 = vmul.f32 1.442695, %v804_v29  ;;  %908 = vrot.lane.b32.xlu0 %v875_v30, %s1562_s28  ;;  %s1742_s28 = scalar_lea.vmem %s1798_s14, %s1804_s29 }
  0xf0   : > { %842 = vst.msk [vmem:[%s1742_s28] sm:$0x1] %vm841_vm5, %v1558_v1 }
  0xf1   : > { %1528 = vpow2.f32 %v807_v31 }
  0xf3   : > { %789 = vrot.lane.b32.xlu0 %v1710_v23, %s1561_s27 }
  0xf9   : > { %v1527_v32 = vpop.eup %1526 }
  0xfa   : > { %811 = vrot.lane.b32.xlu1 %v1527_v32, %s1563_s17 }
  0xfb   : > { %v1529_v33 = vpop.eup %1528 }
  0xfc   : > { %813 = vrot.lane.b32.xlu0 %v1529_v33, %s1563_s17 }
 0x15f   : > { %v792_v36 = vpop.permute.xlu1 %791 }
 0x160   : > { %v796_v38 = vsub.f32 %v1713_v27, %v792_v36 }
 0x161   : > { %v909_v34 = vpop.permute.xlu0 %908 }
 0x162   : > { %1410 = vmatmul.mubr.msk.bf16.vlgmr.msra.gmra.mrb[4].mxu1 %vm881_vm4, %v909_v34  ;;  %1469 = vmatmul.mubr.msk.bf16.vlgmr.msra.gmra.mrb[4].mxu0 %vm881_vm4, %v909_v34  ;;  %v802_v42 = vmul.f32 %v796_v38, %v796_v38  ;;  %v799_v49 = vmul.f32 1.442695, %v796_v38 }
 0x163   : > { %1478 = vmatprep.mubr.msk.bf16.mxu1 %vm1559_vm0, %v1558_v1  ;;  %1473 = vmatpush3.bf16.msra.mxu1 %v1523_v45 }
 0x164   : > { %1474 = vmatprep.subr.bf16.mxu1 %v1558_v1 }
 0x165   : > { %v790_v35 = vpop.permute.xlu0 %789 }
 0x166   : > { %v795_v37 = vsub.f32 %v1710_v23, %v790_v35 }
 0x167   : > { %1475 = vmatpush3.bf16.msra.mxu1 %v1524_v46 }
 0x168   : > { %v801_v39 = vmul.f32 %v795_v37, %v795_v37  ;;  %1476 = vmatprep.subr.bf16.mxu1 %v1558_v1  ;;  %v797_v48 = vmul.f32 1.442695, %v795_v37 }
 0x16a   : > { %1530 = vpow2.f32 %v797_v48 }
 0x16b   : > { %1477 = vmatpush3.bf16.msra.mxu1 %v1525_v47  ;;  %1532 = vpow2.f32 %v799_v49 }
 0x16c   : > { %v812_v40 = vpop.permute.xlu1 %811 }
 0x16d   : > { %v817_v41 = vmul.f32 %v812_v40, %v801_v39 }
 0x16e   : > { %v814_v43 = vpop.permute.xlu0 %813 }
 0x16f   : > { %v818_v44 = vmul.f32 %v814_v43, %v802_v42  ;;  %821 = vrot.lane.b32.xlu1 %v817_v41, %s1563_s17 }
 0x171   : > { %823 = vrot.lane.b32.xlu0 %v818_v44, %s1563_s17 }
 0x173   : > { %876 = vrot.lane.b32.xlu1 %v1693_v5, %s1564_s18 }
 0x174   : > { %v1531_v50 = vpop.eup %1530 }
 0x175   : > { %879 = vrot.lane.b32.xlu0 %v875_v30, %s1564_s18  ;;  %v1533_v53 = vpop.eup %1532  ;;  %s609_s18 = scalar_lea.vmem %s1795_s11, %s1426_s26 }
 0x1e1   : > { %v822_v51 = vpop.permute.xlu1 %821 }
 0x1e2   : > { %v827_v52 = vadd.f32 %v1531_v50, %v822_v51  ;;  %v843_v51 = vld [vmem:[%s1742_s28] sm:$0x1] }
 0x1e3   : > { %v824_v54 = vpop.permute.xlu0 %823 }
 0x1e4   : > { %v1403_v55 = vadd.f32 -1.0, %v827_v52  ;;  %v828_v56 = vadd.f32 %v1533_v53, %v824_v54  ;;  %v1415_v54 = vld [vmem:[%s1794_s10] ss:$0 sm:$0xff] }
 0x1e5   : > { %v877_v57 = vpop.permute.xlu1 %876 }
 0x1e6   : > { %v831_v58 = vadd.f32 %v1403_v55, %v790_v35  ;;  %v1404_v59 = vadd.f32 -1.0, %v828_v56 }
 0x1e7   : > { %v880_v60 = vpop.permute.xlu0 %879 }
 0x1e8   : > { %v833_v61 = vsub.f32 %v831_v58, %v1710_v23  ;;  %v832_v62 = vadd.f32 %v1404_v59, %v792_v36  ;;  %v884_v63 = vsel %vm881_vm4, %v877_v57, %v880_v60  ;;  %v896_v23 = vld [vmem:[%s1790_s6] sm:$0x3] }
 0x1e9   : > { %v1405_v0 = vcombine.low %v884_v63, %v884_v63  ;;  %v1406_v1 = vcombine.high %v884_v63, %v884_v63  ;;  %v901_v25 = vrot.slane %v896_v23, %v900_v22 }
 0x1ea   : > { %v835_v2 = vmul.f32 0.5, %v833_v61  ;;  %v834_v3 = vsub.f32 %v832_v62, %v1713_v27  ;;  %v905_v27 = vrot.slane %v896_v23, %v904_v24 }
 0x1eb   : > { %893 = vst.msk [vmem:[%s633_s19] sm:$0xf] %vm892_vm6, %v1405_v0  ;;  %894 = vst.msk [vmem:[%s633_s19 + $0x4] sm:$0xf] %vm892_vm6, %v1406_v1 }
 0x1ec   : > { %v836_v4 = vmul.f32 0.5, %v834_v3  ;;  %v845_v5 = vsel %vm844_vm7, %v835_v2, 0.0 }
 0x1ee   : > { %v846_v6 = vsel %vm844_vm7, %v836_v4, 0.0 }
 0x1ef   : > { %v847_v7 = vadd.f32 %v846_v6, %v845_v5 }
 0x1f1   : > { %v848_v8 = vrot.slane %v847_v7, 4 }
 0x1f3   : > { %v849_v12 = vadd.f32 %v848_v8, %v847_v7 }
 0x1f5   : > { %v850_v13 = vrot.slane %v849_v12, 2 }
 0x1f7   : > { %v851_v16 = vadd.f32 %v850_v13, %v849_v12 }
 0x1f9   : > { %v852_v17 = vrot.slane %v851_v16, 1 }
 0x1fb   : > { %v853_v19 = vadd.f32 %v852_v17, %v851_v16 }
 0x1fd   : > { %v861_v20 = vrot.slane %v853_v19, %v860_v18 }
 0x1ff   : > { %v868_v21 = vrot.slane %v861_v20, %v860_v18 }
 0x201   : > { %869 = vrot.lane.b32.xlu1 %v868_v21, %s1566_s20 }
 0x235   : > { %v959_v28 = vpop.f32.mrb[4].mxu1  ;;  %v1031_v29 = vpop.f32.mrb[4].mxu0 }
 0x236   : > { %v960_v30 = vadd.f32 %v959_v28, %v901_v25  ;;  %v1032_v31 = vadd.f32 %v1413_v26, %v1031_v29  ;;  %v961_v32 = vpop.f32.mrb[5].mxu1  ;;  %v1470_v33 = vpop.f32.mrb[5].mxu0 }
 0x237   : > { %v962_v34 = vadd.f32 %v961_v32, %v905_v27  ;;  %v963_v35 = vpop.f32.mrb[6].mxu1  ;;  %v1034_v36 = vpop.f32.mrb[6].mxu0 }
 0x238   : > { %v968_v37 = vmax.f32 %v960_v30, 0.0  ;;  %v964_v38 = vadd.f32 %v963_v35, %v901_v25  ;;  %v1035_v39 = vadd.f32 %v1413_v26, %v1034_v36  ;;  %v965_v40 = vpop.f32.mrb[7].mxu1  ;;  %v1471_v41 = vpop.f32.mrb[7].mxu0  ;;  %v1038_v44 = vmax.f32 %v1032_v31, 0.0 }
 0x239   : > { %v969_v42 = vmax.f32 %v962_v34, 0.0  ;;  %v966_v43 = vadd.f32 %v965_v40, %v905_v27 }
 0x23a   : > { %v970_v45 = vmax.f32 %v964_v38, 0.0  ;;  %v1039_v46 = vmax.f32 %v1035_v39, 0.0 }
 0x23b   : > { %v1429_v47 = vpack.c.bf16 %v969_v42, %v968_v37  ;;  %v971_v48 = vmax.f32 %v966_v43, 0.0 }
 0x23c   : > { %v1040_v49 = vpack.c.bf16 %v1039_v46, %v1038_v44 }
 0x23d   : > { %984 = vst [vmem:[%s609_s18] sm:$0xff] %v1429_v47  ;;  %v1430_v50 = vpack.c.bf16 %v971_v48, %v970_v45 }
 0x23e   : > { %1479 = vmatmul.mubr.msk.bf16.vlgmr.msra.gmra.mrb[8].mxu1 %vm677_vm2, %v1040_v49 }
 0x23f   : > { %985 = vst [vmem:[%s609_s18 + $0x8] sm:$0xff] %v1430_v50 }
 0x273   : > { %v870_v52 = vpop.permute.xlu1 %869 }
 0x274   : > { %v872_v53 = vadd.f32 %v870_v52, %v843_v51 }
 0x276   : > { %874 = vst.msk [vmem:[%s1742_s28] sm:$0x1] %vm841_vm5, %v872_v53 }
 0x311   : > { %v1109_v55 = vpop.f32.mrb[8].mxu1 }
 0x312   : > { %v1110_v56 = vadd.f32 %v1415_v54, %v1109_v55  ;;  %v1480_v57 = vpop.f32.mrb[9].mxu1 }
 0x313   : > { %v1112_v58 = vpop.f32.mrb[10].mxu1 }
 0x314   : > { %v1113_v59 = vadd.f32 %v1415_v54, %v1112_v58  ;;  %v1481_v60 = vpop.f32.mrb[11].mxu1  ;;  %v1116_v61 = vmax.f32 %v1110_v56, 0.0 }
 0x316   : > { %v1117_v62 = vmax.f32 %v1113_v59, 0.0 }
 0x318   : > { %v1436_v63 = vpack.c.bf16 %v1117_v62, %v1116_v61 }
 0x31a   : > { %1437 = vst [vmem:[%s621_s22] sm:$0xff] %v1436_v63  }
 0x31b PF: > { %s25_s15 = sadd.s32 1, %s1556_s15   ;;  %s1799_s29 = smov %s1552_s30 }
 0x31c   : > { %p22_p5 = scmp.ge.s32.totalorder %s25_s15, 4   ;;  %s1800_s30 = smov %s1802_s16 }
 0x31e   :  { %24 = sbr.rel (!%p22_p5) target bundleno = 2 (0x2), region = 137 }

// kernel: closed_call.42
= control target key start
LH: loop header
LB: loop body
LE: loop exit
PB: predicated region body
PF: predicated region fallthrough
CT: control target
= control target key end

     0   :  { %s2390_s18 = smov 0   ;;  %s2392_s19 = smov 0   ;;  %s2731_s0 = inlined_call_operand.vmem [shape: bf16[2,64,64], index: 0, kind: input, shape index: {}]   ;;  %s2732_s1 = inlined_call_operand.vmem [shape: bf16[2,64,16], index: 1, kind: input, shape index: {}]   ;;  %s2733_s2 = inlined_call_operand.vmem [shape: bf16[2,64,32], index: 2, kind: input, shape index: {}]   ;;  %s2734_s3 = inlined_call_operand.vmem [shape: bf16[2,64,32], index: 3, kind: input, shape index: {}]   ;;  %s2735_s4 = inlined_call_operand.vmem [shape: f32[2,64,48], index: 4, kind: input, shape index: {}]   ;;  %s2736_s5 = inlined_call_operand.vmem [shape: bf16[64,32], index: 5, kind: input, shape index: {}]   ;;  %s2737_s6 = inlined_call_operand.vmem [shape: bf16[16,32], index: 6, kind: input, shape index: {}]   ;;  %s2738_s7 = inlined_call_operand.vmem [shape: bf16[32,32], index: 7, kind: input, shape index: {}]   ;;  %s2739_s8 = inlined_call_operand.vmem [shape: f32[1,32], index: 8, kind: input, shape index: {}]   ;;  %s2740_s9 = inlined_call_operand.vmem [shape: bf16[8,32], index: 9, kind: input, shape index: {}]   ;;  %s2741_s10 = inlined_call_operand.vmem [shape: f32[1,32], index: 10, kind: input, shape index: {}]   ;;  %s2742_s11 = inlined_call_operand.vmem [shape: bf16[32,48], index: 11, kind: input, shape index: {}]   ;;  %s2743_s12 = inlined_call_operand.vmem [shape: f32[1,48], index: 12, kind: input, shape index: {}]   ;;  %s2744_s13 = inlined_call_operand.vmem [shape: bf16[2,64,16], index: 13, kind: output, shape index: {0}]   ;;  %s2745_s14 = inlined_call_operand.vmem [shape: f32[2,1,8], index: 14, kind: output, shape index: {1}]   ;;  %s2746_s15 = inlined_call_operand.vmem [shape: f32[2,1,48], index: 15, kind: output, shape index: {2}]  }
   0x1   :  { %s2394_s20 = smov 0  }
   0x2 LB: > { %s45_s21 = sadd.s32 1, %s2297_s19  ;;  %p1984_p0 = scmp.ge.s32.totalorder %s2301_s20, 1  ;;  %s2301_s20 = sphi %s2394_s20, %s26_s20   ;;  %s2297_s19 = sphi %s2392_s19, %s2748_s19   ;;  %s2293_s18 = sphi %s2390_s18, %s2747_s18  }
   0x3   : > { %p47_p1 = scmp.ge.s32.totalorder %s45_s21, 2  ;;  %p564_p2 = scmp.lt.s32.totalorder %s2301_s20, 3 }
   0x5   : > { %s2750_s21 = smov (%p47_p1, %s45_s21), 0  ;;  %p565_p3 = pnand %p1984_p0, %p564_p2 }
   0x6   : > { %v2226_v0 = vld [vmem:[%s2737_s6] sm:$0xff] (!%p565_p3)   ;;  %p672_p4 = scmp.lt.s32.totalorder (!%p565_p3), %s2293_s18, 1  ;;  %vm813_vm0 = vcmask (!%p565_p3), 130048   ;;  %v2230_v2 = vld [vmem:[%s2736_s5 + $0x8] sm:$0xff] (!%p565_p3)   ;;  %v2232_v7 = vld [vmem:[%s2736_s5 + $0x10] sm:$0xff] (!%p565_p3)   ;;  %vm1049_vm1 = vcmask (!%p565_p3), 261120  }
   0x7   : > { %568 = sbr.rel (%p565_p3) target bundleno = 862 (0x35e), region = 72  ;;  %v2228_v1 = vld [vmem:[%s2736_s5] sm:$0xff] (!%p565_p3)   ;;  %2114 = vmatprep.subr.bf16.mxu0 (!%p565_p3), %v2226_v0  ;;  %v2238_v9 = vld [vmem:[%s2738_s7 + $0x8] sm:$0xff] (!%p565_p3)   ;;  %v2234_v12 = vld [vmem:[%s2736_s5 + $0x18] sm:$0xff] (!%p565_p3)   ;;  %vm935_vm2 = vcmask (!%p565_p3), 523264   ;;  %vm1461_vm3 = vcmask (!%p565_p3), 1043456  }
   0x8   : > { %2115 = vmatpush3.bf16.msra.mxu0 (!%p565_p3), %v2226_v0  ;;  %v2236_v3 = vld [vmem:[%s2738_s7] sm:$0xff] (!%p565_p3)   ;;  %s2303_s16 = smov (!%p565_p3), 112   ;;  %s2305_s22 = smov (!%p565_p3), 8   ;;  %vm1374_vm4 = vcmask (!%p565_p3), 64512   ;;  %vm1685_vm5 = vcmask (!%p565_p3), 57344   ;;  %vm1687_vm6 = vcmask (!%p565_p3), 385024  }
   0x9   : > { %2124 = vmatprep.subr.bf16.mxu0 (!%p565_p3), %v2228_v1  ;;  %2174 = vmatprep.subr.bf16.mxu1 (!%p565_p3), %v2236_v3  ;;  %v1440_v23 = vld [vmem:[%s2740_s9] sm:$0xf] (!%p565_p3)  ;;  %s2306_s23 = smov (!%p565_p3), 120   ;;  %vm1690_vm7 = vcmask (!%p565_p3), 261312   ;;  %vm1415_vm8 = vcmask (!%p565_p3), 125952   ;;  %s2309_s28 = smov (!%p565_p3), 104  }
   0xa   : > { %2176 = vmatpush3.bf16.msra.mxu1 (!%p565_p3), %v2236_v3  ;;  %v1463_v24 = vsel (!%p565_p3), %vm1461_vm3, %v1440_v23, 0  ;;  %v2028_v30 = vld [vmem:[%s2739_s8] ss:$0 sm:$0xff] (!%p565_p3)  ;;  %vm1734_vm9 = vcmask (!%p565_p3), 392192  }
   0xb   : > { %2175 = vmatprep.subr.bf16.mxu1 (!%p565_p3), %v2238_v9 }
   0xe   : > { %s2752_s18 = smov (!%p672_p4, %s2293_s18), 1  ;;  %2177 = vmatpush3.bf16.msra.mxu1 %v2238_v9 }
   0xf   : > { %s2417_s26 = sshll.u32 %s2752_s18, 5  ;;  %2194 = vmatprep.subr.msk.bf16.mxu1 %vm1461_vm3, %v1440_v23 }
  0x10   : > { %s691_s29 = scalar_lea.vmem %s2732_s1, %s2417_s26  ;;  %s2443_s25 = scalar_lea.vmem %s2731_s0, %s2417_s26 }
  0x11   : > { %v2429_v4 = vld [vmem:[%s691_s29] sm:$0xff]   ;;  %v2431_v5 = vld [vmem:[%s691_s29 + $0x8] sm:$0xff]   ;;  %v2435_v6 = vld [vmem:[%s691_s29 + $0x10] sm:$0xff]   ;;  %s2456_s17 = scalar_lea.vmem %s2733_s2, %s2417_s26  ;;  %s739_s27 = scalar_lea.vmem %s2744_s13, %s2417_s26 }
  0x12   : > { %2116 = vmatprep.mubr.msk.bf16.mxu0 %vm813_vm0, %v2429_v4  ;;  %v2450_v8 = vld [vmem:[%s691_s29 + $0x18] sm:$0xff]   ;;  %v2235_v10 = vld [vmem:[%s2443_s25] sm:$0xff]   ;;  %v2240_v11 = vld [vmem:[%s2456_s17 + $0x10] sm:$0xff]  }
  0x13   : > { %2117 = vmatmul.mubr.msk.bf16.vlgmr.msra.gmra.mrb[0].mxu0 %vm813_vm0, %v2431_v5  ;;  %2148 = vmatprep.mubr.msk.bf16.mxu1 %vm1049_vm1, %v2240_v11  ;;  %v2242_v13 = vld [vmem:[%s2456_s17 + $0x18] sm:$0xff]   ;;  %v2237_v14 = vld [vmem:[%s2443_s25 + $0x8] sm:$0xff]   ;;  %v2239_v15 = vld [vmem:[%s2443_s25 + $0x10] sm:$0xff]  }
  0x14   : > { %2125 = vmatpush3.bf16.msra.mxu0 %v2228_v1  ;;  %2120 = vmatprep.mubr.msk.bf16.mxu0 %vm813_vm0, %v2435_v6  ;;  %v2241_v16 = vld [vmem:[%s2443_s25 + $0x18] sm:$0xff]   ;;  %v2243_v17 = vld [vmem:[%s2456_s17] sm:$0xff]   ;;  %v2244_v18 = vld [vmem:[%s2456_s17 + $0x8] sm:$0xff]   ;;  %s2304_s17 = smov 16  }
  0x15   : > { %2126 = vmatprep.subr.bf16.mxu0 %v2230_v2  ;;  %2149 = vmatmul.mubr.msk.bf16.vlgmr.msra.gmra.mrb[0].mxu1 %vm1049_vm1, %v2242_v13 }
  0x16   : > { %2153 = vmatpush3.bf16.msra.mxu1 %v1463_v24 }
  0x18   : > { %2127 = vmatpush3.bf16.msra.mxu0 %v2230_v2 }
  0x19   : > { %2128 = vmatprep.subr.bf16.mxu0 %v2232_v7 }
  0x1b   : > { %2121 = vmatmul.mubr.msk.bf16.gmra.mrb[4].mxu0 %vm813_vm0, %v2450_v8 }
  0x1c   : > { %2129 = vmatpush3.bf16.msra.mxu0 %v2232_v7  ;;  %2132 = vmatprep.mubr.msk.bf16.mxu0 %vm935_vm2, %v2235_v10 }
  0x1d   : > { %2130 = vmatprep.subr.bf16.mxu0 %v2234_v12 }
  0x20   : > { %2131 = vmatpush3.bf16.msra.mxu0 %v2234_v12 }
  0x21   : > { %2140 = vmatprep.subr.bf16.mxu0 %v2236_v3 }
  0x23   : > { %2133 = vmatmul.mubr.msk.bf16.vlgmr.msra.gmra.mrb[0].mxu0 %vm935_vm2, %v2237_v14 }
  0x24   : > { %2141 = vmatpush3.bf16.msra.mxu0 %v2236_v3  ;;  %2136 = vmatprep.mubr.msk.bf16.mxu0 %vm935_vm2, %v2239_v15 }
  0x25   : > { %2142 = vmatprep.subr.bf16.mxu0 %v2238_v9 }
  0x28   : > { %2143 = vmatpush3.bf16.msra.mxu0 %v2238_v9 }
  0x2b   : > { %2137 = vmatmul.mubr.msk.bf16.gmra.mrb[4].mxu0 %vm935_vm2, %v2241_v16 }
  0x2c   : > { %2144 = vmatprep.mubr.msk.bf16.mxu0 %vm1049_vm1, %v2243_v17 }
  0x33   : > { %2145 = vmatmul.mubr.msk.bf16.vlgmr.msra.gmra.mrb[0].mxu0 %vm1049_vm1, %v2244_v18 }
  0xe8   : > { %v2150_v19 = vpop.f32.mrb[0].mxu1 }
  0xe9   : > { %v1112_v20 = vpop.f32.mrb[1].mxu1 }
  0xea   : > { %v2151_v21 = vpop.f32.mrb[2].mxu1 }
  0xeb   : > { %v1115_v22 = vpop.f32.mrb[3].mxu1 }
  0xfe   : > { %v2138_v25 = vpop.f32.mrb[4].mxu0 }
  0xff   : > { %v2178_v26 = vadd.f32 %v2150_v19, %v2138_v25  ;;  %v998_v27 = vpop.f32.mrb[5].mxu0 }
 0x100   : > { %v2179_v28 = vadd.f32 %v1112_v20, %v998_v27  ;;  %v2139_v29 = vpop.f32.mrb[6].mxu0 }
 0x101   : > { %v2180_v31 = vadd.f32 %v2151_v21, %v2139_v29  ;;  %v1001_v32 = vpop.f32.mrb[7].mxu0  ;;  %v2500_v41 = vadd.f32 %v2178_v26, %v2028_v30 }
 0x102   : > { %v2181_v33 = vadd.f32 %v1115_v22, %v1001_v32  ;;  %v2488_v34 = vadd.f32 %v2179_v28, %v2028_v30 }
 0x103   : > { %v2492_v36 = vadd.f32 %v2180_v31, %v2028_v30  ;;  %v1220_v3 = vsub.f32 0.0, %v2500_v41 }
 0x104   : > { %v2490_v35 = vadd.f32 %v2181_v33, %v2028_v30  ;;  %v1218_v55 = vsub.f32 0.0, %v2488_v34 }
 0x105   : > { %v2512_v48 = vpack.c.bf16 %v2492_v36, %v2500_v41  ;;  %v1221_v62 = vsub.f32 0.0, %v2492_v36  ;;  %v1234_v9 = vmul.f32 1.442695, %v1220_v3 }
 0x106   : > { %v2146_v37 = vpop.f32.mrb[0].mxu0  ;;  %v2496_v38 = vpack.c.bf16 %v2490_v35, %v2488_v34  ;;  %v1230_v58 = vmul.f32 1.442695, %v1218_v55  ;;  %v1219_v59 = vsub.f32 0.0, %v2490_v35 }
 0x107   : > { %v2498_v39 = vadd.f32 %v2146_v37, %v2028_v30  ;;  %v1096_v40 = vpop.f32.mrb[1].mxu0  ;;  %v1236_v1 = vmul.f32 1.442695, %v1221_v62 }
 0x108   : > { %1445 = vrot.lane.b32.xlu1 %v2496_v38, %s2303_s16  ;;  %v2147_v42 = vpop.f32.mrb[2].mxu0  ;;  %v2506_v46 = vadd.f32 %v2028_v30, %v1096_v40  ;;  %v1232_v63 = vmul.f32 1.442695, %v1219_v59 }
 0x109   : > { %v1216_v43 = vsub.f32 0.0, %v2498_v39  ;;  %v2504_v44 = vadd.f32 %v2147_v42, %v2028_v30  ;;  %v1099_v45 = vpop.f32.mrb[3].mxu0 }
 0x10a   : > { %v2508_v47 = vadd.f32 %v2028_v30, %v1099_v45  ;;  %v1214_v57 = vsub.f32 0.0, %v2506_v46 }
 0x10b   : > { %v1226_v49 = vmul.f32 1.442695, %v1216_v43  ;;  %v1217_v50 = vsub.f32 0.0, %v2504_v44  ;;  %v2526_v54 = vpack.c.bf16 %v2504_v44, %v2498_v39 }
 0x10c   : > { %1447 = vrot.lane.b32.xlu1 %v2512_v48, %s2303_s16  ;;  %v2518_v51 = vpack.c.bf16 %v2508_v47, %v2506_v46  ;;  %v1215_v53 = vsub.f32 0.0, %v2508_v47  ;;  %v1222_v61 = vmul.f32 1.442695, %v1214_v57 }
 0x10d   : > { %2247 = vpow2.f32 %v1226_v49  ;;  %v1228_v52 = vmul.f32 1.442695, %v1217_v50 }
 0x10e   : > { %1441 = vrot.lane.b32.xlu0 %v2518_v51, %s2303_s16  ;;  %v1224_v56 = vmul.f32 1.442695, %v1215_v53 }
 0x10f   : > { %2249 = vpow2.f32 %v1228_v52 }
 0x110   : > { %1160 = vrot.lane.b32.xlu1 %v2508_v47, %s2304_s17  ;;  %2251 = vpow2.f32 %v1224_v56 }
 0x111   : > { %2253 = vpow2.f32 %v1230_v58 }
 0x112   : > { %1443 = vrot.lane.b32.xlu0 %v2526_v54, %s2303_s16  ;;  %2255 = vpow2.f32 %v1222_v61  ;;  %s2626_s16 = scalar_lea.vmem %s2745_s14, %s2752_s18 }
 0x113   : > { %2257 = vpow2.f32 %v1232_v63 }
 0x114   : > { %1164 = vrot.lane.b32.xlu1 %v2504_v44, %s2304_s17  ;;  %2259 = vpow2.f32 %v1236_v1 }
 0x115   : > { %2261 = vpow2.f32 %v1234_v9 }
 0x116   : > { %1158 = vrot.lane.b32.xlu0 %v2506_v46, %s2304_s17 }
 0x117   : > { %v2248_v60 = vpop.eup %2247 }
 0x118   : > { %1250 = vrot.lane.b32.xlu1 %v2248_v60, %s2305_s22 }
 0x119   : > { %v2250_v0 = vpop.eup %2249 }
 0x11a   : > { %1162 = vrot.lane.b32.xlu0 %v2498_v39, %s2304_s17  ;;  %v2252_v2 = vpop.eup %2251 }
 0x11b   : > { %v2254_v7 = vpop.eup %2253 }
 0x11c   : > { %1252 = vrot.lane.b32.xlu1 %v2250_v0, %s2305_s22  ;;  %v2256_v10 = vpop.eup %2255 }
 0x11d   : > { %v2258_v11 = vpop.eup %2257 }
 0x11e   : > { %1166 = vrot.lane.b32.xlu0 %v2488_v34, %s2304_s17  ;;  %v2260_v12 = vpop.eup %2259 }
 0x11f   : > { %v2262_v13 = vpop.eup %2261 }
 0x120   : > { %1248 = vrot.lane.b32.xlu1 %v2252_v2, %s2305_s22 }
 0x122   : > { %1168 = vrot.lane.b32.xlu0 %v2490_v35, %s2304_s17 }
 0x124   : > { %1254 = vrot.lane.b32.xlu1 %v2254_v7, %s2305_s22 }
 0x126   : > { %1246 = vrot.lane.b32.xlu0 %v2256_v10, %s2305_s22  ;;  %v2245_v10 = vld [vmem:[%s2742_s11] sm:$0xff]  }
 0x127   : > { %2162 = vmatprep.subr.bf16.mxu1 %v2245_v10 }
 0x128   : > { %1256 = vrot.lane.b32.xlu1 %v2258_v11, %s2305_s22 }
 0x12a   : > { %1170 = vrot.lane.b32.xlu0 %v2500_v41, %s2304_s17 }
 0x12c   : > { %1260 = vrot.lane.b32.xlu1 %v2260_v12, %s2305_s22 }
 0x12e   : > { %1172 = vrot.lane.b32.xlu0 %v2492_v36, %s2304_s17  ;;  %s715_s17 = scalar_lea.vmem %s2734_s3, %s2417_s26  ;;  %s2063_s26 = sshll.u32 %s2752_s18, 6 }
 0x132   : > { %1258 = vrot.lane.b32.xlu0 %v2262_v13, %s2305_s22 }
 0x17a   : > { %v1446_v14 = vpop.permute.xlu1 %1445 }
 0x17e   : > { %v1448_v15 = vpop.permute.xlu1 %1447 }
 0x180   : > { %v1442_v16 = vpop.permute.xlu0 %1441 }
 0x181   : > { %2154 = vmatprep.mubr.msk.bf16.mxu1 %vm1374_vm4, %v1442_v16 }
 0x182   : > { %v2557_v17 = vpop.permute.xlu1 %1160 }
 0x183   : > { %v2569_v23 = vsub.f32 %v2508_v47, %v2557_v17 }
 0x184   : > { %v1444_v18 = vpop.permute.xlu0 %1443 }
 0x185   : > { %2155 = vmatmul.mubr.msk.bf16.vlgmr.msra.gmra.mrb[4].mxu1 %vm1374_vm4, %v1444_v18  ;;  %v1207_v27 = vmul.f32 %v2569_v23, %v2569_v23 }
 0x186   : > { %v2560_v19 = vpop.permute.xlu1 %1164  ;;  %2158 = vmatprep.mubr.msk.bf16.mxu1 %vm1374_vm4, %v1446_v14  ;;  %2163 = vmatpush3.bf16.msra.mxu1 %v2245_v10 }
 0x187   : > { %v2576_v26 = vsub.f32 %v2504_v44, %v2560_v19 }
 0x188   : > { %v2563_v20 = vpop.permute.xlu0 %1158 }
 0x189   : > { %v1182_v29 = vsub.f32 %v2506_v46, %v2563_v20  ;;  %v1209_v33 = vmul.f32 %v2576_v26, %v2576_v26 }
 0x18a   : > { %v1251_v21 = vpop.permute.xlu1 %1250 }
 0x18b   : > { %v1206_v43 = vmul.f32 %v1182_v29, %v1182_v29 }
 0x18c   : > { %v2565_v22 = vpop.permute.xlu0 %1162 }
 0x18d   : > { %2159 = vmatmul.mubr.msk.bf16.gmra.mrb[8].mxu1 %vm1374_vm4, %v1448_v15  ;;  %v1184_v32 = vsub.f32 %v2498_v39, %v2565_v22 }
 0x18e   : > { %v1253_v24 = vpop.permute.xlu1 %1252 }
 0x18f   : > { %v1273_v42 = vmul.f32 %v1253_v24, %v1209_v33  ;;  %v1208_v49 = vmul.f32 %v1184_v32, %v1184_v32 }
 0x190   : > { %v2572_v25 = vpop.permute.xlu0 %1166 }
 0x191   : > { %v1186_v55 = vsub.f32 %v2488_v34, %v2572_v25  ;;  %v1272_v58 = vmul.f32 %v1251_v21, %v1208_v49 }
 0x192   : > { %v1249_v28 = vpop.permute.xlu1 %1248 }
 0x193   : > { %v1271_v30 = vmul.f32 %v1249_v28, %v1207_v27  ;;  %v1210_v59 = vmul.f32 %v1186_v55, %v1186_v55  ;;  %v1198_v11 = vmul.f32 1.442695, %v1186_v55 }
 0x194   : > { %v2582_v31 = vpop.permute.xlu0 %1168 }
 0x195   : > { %v1187_v37 = vsub.f32 %v2490_v35, %v2582_v31  ;;  %1288 = vrot.lane.b32.xlu1 %v1271_v30, %s2305_s22 }
 0x196   : > { %v1255_v40 = vpop.permute.xlu1 %1254 }
 0x197   : > { %v1211_v52 = vmul.f32 %v1187_v37, %v1187_v37  ;;  %v1274_v62 = vmul.f32 %v1255_v40, %v1210_v59 }
 0x198   : > { %v1247_v45 = vpop.permute.xlu0 %1246 }
 0x199   : > { %v1270_v50 = vmul.f32 %v1247_v45, %v1206_v43  ;;  %1292 = vrot.lane.b32.xlu1 %v1273_v42, %s2305_s22 }
 0x19a   : > { %v1257_v53 = vpop.permute.xlu1 %1256 }
 0x19b   : > { %v1275_v56 = vmul.f32 %v1257_v53, %v1211_v52  ;;  %1286 = vrot.lane.b32.xlu0 %v1270_v50, %s2305_s22 }
 0x19c   : > { %v2595_v57 = vpop.permute.xlu0 %1170 }
 0x19d   : > { %1296 = vrot.lane.b32.xlu1 %v1275_v56, %s2305_s22  ;;  %v1188_v60 = vsub.f32 %v2500_v41, %v2595_v57 }
 0x19e   : > { %v1261_v2 = vpop.permute.xlu1 %1260 }
 0x19f   : > { %1290 = vrot.lane.b32.xlu0 %v1272_v58, %s2305_s22  ;;  %v1212_v1 = vmul.f32 %v1188_v60, %v1188_v60  ;;  %v1202_v14 = vmul.f32 1.442695, %v1188_v60 }
 0x1a0   : > { %v2601_v61 = vpop.permute.xlu0 %1172 }
 0x1a1   : > { %v1189_v63 = vsub.f32 %v2492_v36, %v2601_v61 }
 0x1a3   : > { %v1213_v0 = vmul.f32 %v1189_v63, %v1189_v63  ;;  %1294 = vrot.lane.b32.xlu0 %v1274_v62, %s2305_s22  ;;  %v1204_v18 = vmul.f32 1.442695, %v1189_v63 }
 0x1a4   : > { %v1259_v3 = vpop.permute.xlu0 %1258 }
 0x1a5   : > { %v1276_v7 = vmul.f32 %v1259_v3, %v1212_v1  ;;  %v1277_v9 = vmul.f32 %v1261_v2, %v1213_v0 }
 0x1a7   : > { %1298 = vrot.lane.b32.xlu0 %v1276_v7, %s2305_s22  ;;  %1300 = vrot.lane.b32.xlu1 %v1277_v9, %s2305_s22 }
 0x1ab   : > { %1354 = vrot.lane.b32.xlu0 %v2429_v4, %s2306_s23  ;;  %1356 = vrot.lane.b32.xlu1 %v2431_v5, %s2306_s23  ;;  %v2246_v4 = vld [vmem:[%s2742_s11 + $0x8] sm:$0xff]   ;;  %v2307_v5 = vmov 0.0  }
 0x1ac   : > { %2164 = vmatprep.subr.bf16.mxu1 %v2246_v4  ;;  %1686 = vst.msk [vmem:[%s2626_s16] sm:$0x1] %vm1685_vm5, %v2307_v5 }
 0x1ad   : > { %2165 = vmatpush3.bf16.msra.mxu1 %v2246_v4 }
 0x1af   : > { %1358 = vrot.lane.b32.xlu0 %v2435_v6, %s2306_s23  ;;  %1360 = vrot.lane.b32.xlu1 %v2450_v8, %s2306_s23  ;;  %v1192_v6 = vmul.f32 1.442695, %v2569_v23  ;;  %v1196_v8 = vmul.f32 1.442695, %v2576_v26 }
 0x1b1   : > { %2263 = vpow2.f32 %v1192_v6 }
 0x1b2   : > { %2265 = vpow2.f32 %v1196_v8 }
 0x1b3   : > { %1366 = vrot.lane.b32.xlu0 %v2518_v51, %s2306_s23  ;;  %1368 = vrot.lane.b32.xlu1 %v2526_v54, %s2306_s23  ;;  %v1194_v51 = vmul.f32 1.442695, %v1184_v32 }
 0x1b7   : > { %1370 = vrot.lane.b32.xlu0 %v2496_v38, %s2306_s23  ;;  %1372 = vrot.lane.b32.xlu1 %v2512_v48, %s2306_s23  ;;  %s2632_s23 = scalar_lea.vmem %s2746_s15, %s2752_s18  ;;  %v1190_v38 = vmul.f32 1.442695, %v1182_v29  ;;  %v1200_v48 = vmul.f32 1.442695, %v1187_v37 }
 0x1b8   : > { %1688 = vst.msk [vmem:[%s2632_s23] sm:$0x1] %vm1687_vm6, %v2307_v5 }
 0x1b9   : > { %2267 = vpow2.f32 %v1190_v38 }
 0x1ba   : > { %2269 = vpow2.f32 %v1200_v48 }
 0x1bb   : > { %v2264_v54 = vpop.eup %2263  ;;  %2271 = vpow2.f32 %v1194_v51 }
 0x1bc   : > { %v2266_v16 = vpop.eup %2265  ;;  %2273 = vpow2.f32 %v1198_v11 }
 0x1bd   : > { %2275 = vpow2.f32 %v1202_v14 }
 0x1be   : > { %2277 = vpow2.f32 %v1204_v18 }
 0x1c3   : > { %v2268_v26 = vpop.eup %2267 }
 0x1c4   : > { %v2270_v29 = vpop.eup %2269 }
 0x1c5   : > { %v2272_v43 = vpop.eup %2271 }
 0x1c6   : > { %v2274_v55 = vpop.eup %2273 }
 0x207   : > { %v1289_v12 = vpop.permute.xlu1 %1288 }
 0x208   : > { %v1311_v13 = vadd.f32 %v2264_v54, %v1289_v12 }
 0x20a   : > { %v2030_v15 = vadd.f32 -1.0, %v1311_v13 }
 0x20b   : > { %v1293_v21 = vpop.permute.xlu1 %1292 }
 0x20c   : > { %v1327_v23 = vadd.f32 %v2030_v15, %v2557_v17  ;;  %v1313_v24 = vadd.f32 %v2266_v16, %v1293_v21 }
 0x20d   : > { %v1287_v27 = vpop.permute.xlu0 %1286 }
 0x20e   : > { %v1310_v28 = vadd.f32 %v2268_v26, %v1287_v27  ;;  %v2032_v30 = vadd.f32 -1.0, %v1313_v24  ;;  %v1335_v33 = vsub.f32 %v1327_v23, %v2508_v47 }
 0x20f   : > { %v1297_v32 = vpop.permute.xlu1 %1296 }
 0x210   : > { %v2029_v37 = vadd.f32 -1.0, %v1310_v28  ;;  %v1315_v40 = vadd.f32 %v2270_v29, %v1297_v32  ;;  %v1329_v49 = vadd.f32 %v2032_v30, %v2560_v19  ;;  %v1343_v52 = vmul.f32 0.5, %v1335_v33 }
 0x211   : > { %v1291_v42 = vpop.permute.xlu0 %1290 }
 0x212   : > { %v1326_v45 = vadd.f32 %v2029_v37, %v2563_v20  ;;  %v2034_v17 = vadd.f32 -1.0, %v1315_v40  ;;  %v1312_v50 = vadd.f32 %v2272_v43, %v1291_v42  ;;  %v1337_v47 = vsub.f32 %v1329_v49, %v2504_v44  ;;  %v2276_v20 = vpop.eup %2275 }
 0x213   : > { %v1692_v19 = vsel %vm1690_vm7, %v1343_v52, 0.0  ;;  %v2278_v2 = vpop.eup %2277 }
 0x214   : > { %v1334_v53 = vsub.f32 %v1326_v45, %v2506_v46  ;;  %v2031_v56 = vadd.f32 -1.0, %v1312_v50  ;;  %v1331_v62 = vadd.f32 %v2034_v17, %v2582_v31  ;;  %v1345_v5 = vmul.f32 0.5, %v1337_v47 }
 0x215   : > { %v1295_v58 = vpop.permute.xlu0 %1294  ;;  %v2308_v17 = vmov 1966171168  }
 0x216   : > { %v1342_v59 = vmul.f32 0.5, %v1334_v53  ;;  %v1314_v60 = vadd.f32 %v2274_v55, %v1295_v58  ;;  %v1328_v63 = vadd.f32 %v2031_v56, %v2565_v22  ;;  %v1339_v31 = vsub.f32 %v1331_v62, %v2490_v35 }
 0x217   : > { %v1696_v13 = vsel %vm1690_vm7, %v1345_v5, 0.0  ;;  %v1714_v50 = vunpack.c.l.s4 %v2308_v17  ;;  %v1716_v56 = vlaneseq  ;;  %v2050_v17 = vld [vmem:[%s2743_s12] ss:$0 sm:$0xff] }
 0x218   : > { %v1691_v0 = vsel %vm1690_vm7, %v1342_v59, 0.0  ;;  %v2033_v1 = vadd.f32 -1.0, %v1314_v60  ;;  %v1336_v3 = vsub.f32 %v1328_v63, %v2498_v39  ;;  %v1347_v14 = vmul.f32 0.5, %v1339_v31 }
 0x219   : > { %v1693_v46 = vadd.f32 %v1692_v19, %v1691_v0  ;;  %v1299_v7 = vpop.permute.xlu0 %1298  ;;  %v1301_v9 = vpop.permute.xlu1 %1300  ;;  %v1717_v19 = vshrl.u32 %v1716_v56, 7 }
 0x21a   : > { %v1330_v10 = vadd.f32 %v2033_v1, %v2572_v25  ;;  %v1316_v4 = vadd.f32 %v2276_v20, %v1299_v7  ;;  %v1317_v44 = vadd.f32 %v2278_v2, %v1301_v9  ;;  %v1344_v22 = vmul.f32 0.5, %v1336_v3  ;;  %v2081_v9 = vld [vmem:[%s715_s17 + $0x8] sm:$0xff]  }
 0x21b   : > { %v1715_v20 = vunpack.c.0.s8 %v1714_v50  ;;  %v2072_v5 = vunpack.c.h.bf16 %v2081_v9 }
 0x21c   : > { %v1338_v6 = vsub.f32 %v1330_v10, %v2488_v34  ;;  %v2035_v8 = vadd.f32 -1.0, %v1316_v4  ;;  %v2036_v38 = vadd.f32 -1.0, %v1317_v44  ;;  %v1694_v48 = vsel %vm1690_vm7, %v1344_v22, 0.0  ;;  %v2066_v10 = vld [vmem:[%s715_s17] sm:$0xff]  }
 0x21d   : > { %v1355_v51 = vpop.permute.xlu0 %1354  ;;  %v1357_v54 = vpop.permute.xlu1 %1356  ;;  %v1695_v11 = vadd.f32 %v1694_v48, %v1693_v46  ;;  %v1718_v2 = vsub.s32 %v1715_v20, %v1717_v19  ;;  %v2071_v4 = vunpack.c.l.bf16 %v2081_v9  ;;  %v2067_v44 = vunpack.c.l.bf16 %v2066_v10 }
 0x21e   : > { %v1346_v39 = vmul.f32 0.5, %v1338_v6  ;;  %v1332_v12 = vadd.f32 %v2035_v8, %v2595_v57  ;;  %v1333_v25 = vadd.f32 %v2036_v38, %v2601_v61  ;;  %v1700_v57 = vsel %vm1690_vm7, %v1347_v14, 0.0  ;;  %v2049_v38 = vld [vmem:[%s2741_s10] ss:$0 sm:$0xff] }
 0x21f   : > { %v1697_v15 = vadd.f32 %v1696_v13, %v1695_v11  ;;  %v2068_v22 = vunpack.c.h.bf16 %v2066_v10 }
 0x220   : > { %v1698_v35 = vsel %vm1690_vm7, %v1346_v39, 0.0  ;;  %v1340_v34 = vsub.f32 %v1332_v12, %v2500_v41  ;;  %v1341_v16 = vsub.f32 %v1333_v25, %v2492_v36  ;;  %v2082_v12 = vld [vmem:[%s715_s17 + $0x10] sm:$0xff]  }
 0x221   : > { %v1359_v18 = vpop.permute.xlu0 %1358  ;;  %v1361_v21 = vpop.permute.xlu1 %1360  ;;  %v1699_v23 = vadd.f32 %v1698_v35, %v1697_v15 }
 0x222   : > { %v1348_v24 = vmul.f32 0.5, %v1340_v34  ;;  %v1349_v26 = vmul.f32 0.5, %v1341_v16  ;;  %v2075_v16 = vunpack.c.l.bf16 %v2082_v12 }
 0x223   : > { %v1701_v27 = vadd.f32 %v1700_v57, %v1699_v23 }
 0x224   : > { %v1702_v61 = vsel %vm1690_vm7, %v1348_v24, 0.0  ;;  %v1704_v32 = vsel %vm1690_vm7, %v1349_v26, 0.0  ;;  %v2076_v26 = vunpack.c.h.bf16 %v2082_v12 }
 0x225   : > { %v1367_v28 = vpop.permute.xlu0 %1366  ;;  %v1369_v29 = vpop.permute.xlu1 %1368  ;;  %v1703_v30 = vadd.f32 %v1702_v61, %v1701_v27 }
 0x226   : > { %v1377_v36 = vsel %vm1374_vm4, %v1355_v51, %v1367_v28  ;;  %v1380_v41 = vsel %vm1374_vm4, %v1357_v54, %v1369_v29  ;;  %v2083_v54 = vld [vmem:[%s715_s17 + $0x18] sm:$0xff]  }
 0x227   : > { %v2037_v33 = vcombine.low %v1377_v36, %v1377_v36  ;;  %v2038_v37 = vcombine.high %v1377_v36, %v1377_v36  ;;  %v2039_v40 = vcombine.low %v1380_v41, %v1380_v41  ;;  %v2040_v42 = vcombine.high %v1380_v41, %v1380_v41 }
 0x228   : > { %v1705_v43 = vadd.f32 %v1704_v32, %v1703_v30  ;;  %v2079_v15 = vunpack.c.l.bf16 %v2083_v54 }
 0x229   : > { %1416 = vst.msk [vmem:[%s739_s27] sm:$0xf] %vm1415_vm8, %v2037_v33  ;;  %1417 = vst.msk [vmem:[%s739_s27 + $0x4] sm:$0xf] %vm1415_vm8, %v2038_v37  ;;  %v1371_v45 = vpop.permute.xlu0 %1370  ;;  %v1373_v49 = vpop.permute.xlu1 %1372 }
 0x22a   : > { %1418 = vst.msk [vmem:[%s739_s27 + $0x8] sm:$0xf] %vm1415_vm8, %v2039_v40  ;;  %1419 = vst.msk [vmem:[%s739_s27 + $0xc] sm:$0xf] %vm1415_vm8, %v2040_v42  ;;  %v1706_v52 = vrot.slane %v1705_v43, 4  ;;  %v1383_v53 = vsel %vm1374_vm4, %v1359_v18, %v1371_v45  ;;  %v1386_v55 = vsel %vm1374_vm4, %v1361_v21, %v1373_v49  ;;  %v2080_v21 = vunpack.c.h.bf16 %v2083_v54 }
 0x22b   : > { %v2041_v58 = vcombine.low %v1383_v53, %v1383_v53  ;;  %v2042_v59 = vcombine.high %v1383_v53, %v1383_v53  ;;  %v2043_v60 = vcombine.low %v1386_v55, %v1386_v55  ;;  %v2044_v47 = vcombine.high %v1386_v55, %v1386_v55 }
 0x22c   : > { %v1707_v62 = vadd.f32 %v1706_v52, %v1705_v43  ;;  %v1689_v43 = vld [vmem:[%s2626_s16] sm:$0x1] }
 0x22d   : > { %1420 = vst.msk [vmem:[%s739_s27 + $0x10] sm:$0xf] %vm1415_vm8, %v2041_v58  ;;  %1421 = vst.msk [vmem:[%s739_s27 + $0x14] sm:$0xf] %vm1415_vm8, %v2042_v59 }
 0x22e   : > { %1422 = vst.msk [vmem:[%s739_s27 + $0x18] sm:$0xf] %vm1415_vm8, %v2043_v60  ;;  %1423 = vst.msk [vmem:[%s739_s27 + $0x1c] sm:$0xf] %vm1415_vm8, %v2044_v47  ;;  %v1708_v63 = vrot.slane %v1707_v62, 2 }
 0x230   : > { %v1709_v0 = vadd.f32 %v1708_v63, %v1707_v62 }
 0x232   : > { %v1710_v1 = vrot.slane %v1709_v0, 1 }
 0x234   : > { %v1711_v46 = vadd.f32 %v1710_v1, %v1709_v0 }
 0x236   : > { %v1719_v3 = vrot.slane %v1711_v46, %v1718_v2 }
 0x238   : > { %v1726_v7 = vrot.slane %v1719_v3, %v1718_v2 }
 0x23a   : > { %1727 = vrot.lane.b32.xlu0 %v1726_v7, %s2309_s28  ;;  %s2698_s28 = scalar_lea.vmem %s2735_s4, %s2063_s26 }
 0x23b   : > { %v1659_v53 = vld [vmem:[%s2698_s28 + $0x10] sm:$0xff]  ;;  %v1657_v56 = vld [vmem:[%s2698_s28] sm:$0xff]  ;;  %v1660_v47 = vld [vmem:[%s2698_s28 + $0x18] sm:$0xff] }
 0x23c   : > { %v1658_v63 = vld [vmem:[%s2698_s28 + $0x8] sm:$0xff]  ;;  %v1664_v54 = vld [vmem:[%s2698_s28 + $0x38] sm:$0xff] }
 0x258   : > { %v2156_v31 = vpop.f32.mrb[4].mxu1 }
 0x259   : > { %v1532_v6 = vadd.f32 %v2156_v31, %v2071_v4  ;;  %v1499_v8 = vpop.f32.mrb[5].mxu1  ;;  %v1663_v4 = vld [vmem:[%s2698_s28 + $0x30] sm:$0xff] }
 0x25a   : > { %v1530_v48 = vadd.f32 %v2067_v44, %v1499_v8  ;;  %v2157_v51 = vpop.f32.mrb[6].mxu1 }
 0x25b   : > { %v1533_v11 = vadd.f32 %v2157_v51, %v2072_v5  ;;  %v1502_v39 = vpop.f32.mrb[7].mxu1  ;;  %v1547_v13 = vadd.f32 %v2049_v38, %v1532_v6  ;;  %v1661_v5 = vld [vmem:[%s2698_s28 + $0x20] sm:$0xff] }
 0x25c   : > { %v1531_v25 = vadd.f32 %v2068_v22, %v1502_v39  ;;  %v1545_v35 = vadd.f32 %v2049_v38, %v1530_v48  ;;  %v1662_v39 = vld [vmem:[%s2698_s28 + $0x28] sm:$0xff] }
 0x25d   : > { %v1548_v14 = vadd.f32 %v2049_v38, %v1533_v11 }
 0x25e   : > { %v1546_v34 = vadd.f32 %v2049_v38, %v1531_v25 }
 0x25f   : > { %v1554_v18 = vpack.c.bf16 %v1548_v14, %v1547_v13 }
 0x260   : > { %v1553_v23 = vpack.c.bf16 %v1546_v34, %v1545_v35  ;;  %v2160_v24 = vpop.f32.mrb[8].mxu1 }
 0x261   : > { %v1536_v57 = vadd.f32 %v2160_v24, %v2079_v15  ;;  %v1515_v27 = vpop.f32.mrb[9].mxu1 }
 0x262   : > { %v1534_v61 = vadd.f32 %v2075_v16, %v1515_v27  ;;  %v2161_v28 = vpop.f32.mrb[10].mxu1  ;;  %2166 = vmatprep.mubr.msk.bf16.mxu1 %vm1049_vm1, %v1553_v23 }
 0x263   : > { %v1537_v29 = vadd.f32 %v2161_v28, %v2080_v21  ;;  %v1518_v30 = vpop.f32.mrb[11].mxu1  ;;  %2167 = vmatmul.mubr.msk.bf16.vlgmr.msra.gmra.mrb[12].mxu1 %vm1049_vm1, %v1554_v18  ;;  %v1551_v36 = vadd.f32 %v2049_v38, %v1536_v57 }
 0x264   : > { %v1535_v32 = vadd.f32 %v2076_v26, %v1518_v30  ;;  %v1549_v33 = vadd.f32 %v2049_v38, %v1534_v61 }
 0x265   : > { %v1552_v41 = vadd.f32 %v2049_v38, %v1537_v29 }
 0x266   : > { %v1550_v37 = vadd.f32 %v2049_v38, %v1535_v32 }
 0x267   : > { %v1556_v40 = vpack.c.bf16 %v1552_v41, %v1551_v36 }
 0x268   : > { %v1555_v42 = vpack.c.bf16 %v1550_v37, %v1549_v33 }
 0x26a   : > { %2170 = vmatprep.mubr.msk.bf16.mxu1 %vm1049_vm1, %v1555_v42 }
 0x26b   : > { %2171 = vmatmul.mubr.msk.bf16.gmra.mrb[16].mxu1 %vm1049_vm1, %v1556_v40 }
 0x2ac   : > { %v1728_v45 = vpop.permute.xlu0 %1727 }
 0x2ad   : > { %v1730_v49 = vadd.f32 %v1728_v45, %v1689_v43  ;;  %v1733_v43 = vld [vmem:[%s2632_s23] sm:$0x1] }
 0x2af   : > { %1732 = vst.msk [vmem:[%s2626_s16] sm:$0x1] %vm1685_vm5, %v1730_v49 }
 0x336   : > { %v2168_v50 = vpop.f32.mrb[12].mxu1 }
 0x337   : > { %v1635_v52 = vadd.f32 %v2168_v50, %v2050_v17  ;;  %v1626_v55 = vpop.f32.mrb[13].mxu1 }
 0x338   : > { %v1627_v58 = vadd.f32 %v2050_v17, %v1626_v55  ;;  %v2169_v59 = vpop.f32.mrb[14].mxu1 }
 0x339   : > { %v1638_v60 = vadd.f32 %v2169_v59, %v2050_v17  ;;  %v1629_v62 = vpop.f32.mrb[15].mxu1  ;;  %v1667_v20 = vsub.f32 %v1635_v52, %v1659_v53 }
 0x33a   : > { %v1665_v19 = vsub.f32 %v1627_v58, %v1657_v56  ;;  %v1630_v0 = vadd.f32 %v2050_v17, %v1629_v62 }
 0x33b   : > { %v1668_v2 = vsub.f32 %v1638_v60, %v1660_v47  ;;  %v1675_v3 = vmul.f32 %v1667_v20, %v1667_v20 }
 0x33c   : > { %v1673_v1 = vmul.f32 %v1665_v19, %v1665_v19  ;;  %v1666_v46 = vsub.f32 %v1630_v0, %v1658_v63 }
 0x33d   : > { %v1676_v22 = vmul.f32 %v1668_v2, %v1668_v2  ;;  %v1738_v12 = vsel %vm1734_vm9, %v1675_v3, 0.0 }
 0x33e   : > { %v1674_v7 = vmul.f32 %v1666_v46, %v1666_v46  ;;  %v2172_v9 = vpop.f32.mrb[16].mxu1  ;;  %v1735_v31 = vsel %vm1734_vm9, %v1673_v1, 0.0 }
 0x33f   : > { %v1651_v10 = vadd.f32 %v2172_v9, %v2050_v17  ;;  %v1642_v44 = vpop.f32.mrb[17].mxu1  ;;  %v1740_v35 = vsel %vm1734_vm9, %v1676_v22, 0.0 }
 0x340   : > { %v1736_v6 = vsel %vm1734_vm9, %v1674_v7, 0.0  ;;  %v1643_v8 = vadd.f32 %v2050_v17, %v1642_v44  ;;  %v2173_v38 = vpop.f32.mrb[18].mxu1 }
 0x341   : > { %v1737_v48 = vadd.f32 %v1736_v6, %v1735_v31  ;;  %v1654_v51 = vadd.f32 %v2173_v38, %v2050_v17  ;;  %v1645_v11 = vpop.f32.mrb[19].mxu1  ;;  %v1671_v25 = vsub.f32 %v1651_v10, %v1663_v4 }
 0x342   : > { %v1669_v13 = vsub.f32 %v1643_v8, %v1661_v5  ;;  %v1646_v14 = vadd.f32 %v2050_v17, %v1645_v11 }
 0x343   : > { %v1739_v15 = vadd.f32 %v1738_v12, %v1737_v48  ;;  %v1672_v16 = vsub.f32 %v1654_v51, %v1664_v54  ;;  %v1679_v23 = vmul.f32 %v1671_v25, %v1671_v25 }
 0x344   : > { %v1677_v34 = vmul.f32 %v1669_v13, %v1669_v13  ;;  %v1670_v18 = vsub.f32 %v1646_v14, %v1662_v39 }
 0x345   : > { %v1741_v21 = vadd.f32 %v1740_v35, %v1739_v15  ;;  %v1680_v27 = vmul.f32 %v1672_v16, %v1672_v16  ;;  %v1746_v29 = vsel %vm1734_vm9, %v1679_v23, 0.0 }
 0x346   : > { %v1742_v24 = vsel %vm1734_vm9, %v1677_v34, 0.0  ;;  %v1678_v26 = vmul.f32 %v1670_v18, %v1670_v18 }
 0x347   : > { %v1743_v57 = vadd.f32 %v1742_v24, %v1741_v21  ;;  %v1748_v32 = vsel %vm1734_vm9, %v1680_v27, 0.0 }
 0x348   : > { %v1744_v61 = vsel %vm1734_vm9, %v1678_v26, 0.0 }
 0x349   : > { %v1745_v28 = vadd.f32 %v1744_v61, %v1743_v57 }
 0x34b   : > { %v1747_v30 = vadd.f32 %v1746_v29, %v1745_v28 }
 0x34d   : > { %v1749_v36 = vadd.f32 %v1748_v32, %v1747_v30 }
 0x34f   : > { %v1750_v41 = vrot.slane %v1749_v36, 4 }
 0x351   : > { %v1751_v33 = vadd.f32 %v1750_v41, %v1749_v36 }
 0x353   : > { %v1752_v37 = vrot.slane %v1751_v33, 2 }
 0x355   : > { %v1753_v40 = vadd.f32 %v1752_v37, %v1751_v33 }
 0x357   : > { %v1754_v42 = vrot.slane %v1753_v40, 1 }
 0x359   : > { %v1755_v45 = vadd.f32 %v1754_v42, %v1753_v40 }
 0x35b   : > { %v1756_v49 = vadd.f32 %v1755_v45, %v1733_v43 }
 0x35d   : > { %1758 = vst.msk [vmem:[%s2632_s23] sm:$0x1] %vm1687_vm6, %v1756_v49 }
 0x35e PF: > { %s26_s20 = sadd.s32 1, %s2301_s20   ;;  %s2747_s18 = smov %s2297_s19 }
 0x35f   : > { %p23_p5 = scmp.ge.s32.totalorder %s26_s20, 4   ;;  %s2748_s19 = smov %s2750_s21 }
 0x361   :  { %25 = sbr.rel (!%p23_p5) target bundleno = 2 (0x2), region = 142 }

</bundles_post_ra>
